<compile_context>
chip_gen: v7x
topology: tpu7x:2x2x1
jax: 0.10.0
libtpu: 0.0.40
codegen_flags: <defaults>
</compile_context>

<pallas_src>
import math

import jax
import jax.numpy as jnp
import numpy as np
from jax.experimental import pallas as pl
from jax.experimental.pallas import tpu as pltpu


_VMEM = pl.BlockSpec(memory_space=pltpu.MemorySpace.VMEM)


# ------------------- trace-time (numpy) constant builders -------------------

def _im2col_indices(n, c, h, w):
    """int32 (n*oh*ow, c*16) gather indices into the flattened zero-padded
    input of shape (n, c, h+2, w+2), for a k=4, stride=2, pad=1 conv.
    Column order (c, i, j) matches PyTorch's Conv2d weight.reshape(Cout, -1)."""
    oh, ow = h // 2, w // 2
    hp, wp = h + 2, w + 2
    idx = np.zeros((n * oh * ow, c * 16), np.int32)
    for b in range(n):
        for oy in range(oh):
            for ox in range(ow):
                m = (b * oh + oy) * ow + ox
                for ch in range(c):
                    for i in range(4):
                        for j in range(4):
                            col = (ch * 4 + i) * 4 + j
                            idx[m, col] = (
                                ((b * c + ch) * hp + (2 * oy + i)) * wp + (2 * ox + j)
                            )
    return idx


def _conv_gather_taps_cat(n, s_in, r_blk):
    """Concatenated 0/1 'tap' gather matrix for a k=4, stride=2, pad=1 conv:
    shape (16*r_blk, r_in).

    Activation rows are (n, y, x) row-major over an (s_in, s_in) grid; output
    rows are (n, oy, ox) row-major over (s_in//2, s_in//2).  Rows
    [t*r_blk, (t+1)*r_blk) hold tap t = i*4+j, selecting input row
    (2*oy+i-1, 2*ox+j-1); positions falling in the zero padding stay all-zero
    rows.  r_blk >= n*(s_in//2)**2 is rounded up to a multiple of 8 so the
    in-kernel per-tap row slices stay sublane aligned (extra rows are all-zero
    and sliced away in the kernel)."""
    s_out = s_in // 2
    r_in = n * s_in * s_in
    g = np.zeros((16 * r_blk, r_in), np.float32)
    for i in range(4):
        for j in range(4):
            t = i * 4 + j
            for b in range(n):
                for oy in range(s_out):
                    for ox in range(s_out):
                        y = 2 * oy + i - 1
                        x = 2 * ox + j - 1
                        if 0 <= y < s_in and 0 <= x < s_in:
                            m_out = (b * s_out + oy) * s_out + ox
                            m_in = (b * s_in + y) * s_in + x
                            g[t * r_blk + m_out, m_in] = 1.0
    return g


# ------------------------------ fused kernel --------------------------------

def _gathered_conv(gcat_ref, w_ref, a):
    """Conv = one big gather matmul + 16 per-tap weight matmuls (all MXU work).

    gcat_ref: (16*R_blk, R_in) constant 0/1 gather matrix (taps stacked on rows).
    w_ref:    (16, Cin, Cout) per-tap weight slices (W[:, :, i, j].T).
    a:        (R_in, Cin) activation (rows = flattened (n, y, x), lanes = chans).
    """
    r_blk = gcat_ref.shape[0] // 16
    p = jnp.dot(gcat_ref[...], a, preferred_element_type=jnp.float32)  # (16*R_blk, Cin)
    acc = None
    for t in range(16):
        p_t = p[t * r_blk:(t + 1) * r_blk, :]                          # static, 8-aligned
        c_t = jnp.dot(p_t, w_ref[t], preferred_element_type=jnp.float32)  # (R_blk, Cout)
        acc = c_t if acc is None else acc + c_t
    return acc


def _make_fused_kernel(n_blocks, r_outs, *, eps=1e-5, alpha0=0.1, alpha=0.2):
    """conv0+bias+LReLU, n_blocks x (conv+BN+LReLU), conv+bias+sigmoid."""

    def kernel(*refs):
        out_ref = refs[-1]
        ins = refs[:-1]

        # ---- layer 0: precomputed patches @ W0 + b0, LeakyReLU(alpha0)
        p0, w0, b0 = ins[0], ins[1], ins[2]
        y = jnp.dot(p0[...], w0[...], preferred_element_type=jnp.float32) + b0[...]
        a = jnp.maximum(y, alpha0 * y)

        # ---- inner blocks: conv (no bias) + BatchNorm(batch stats) + LeakyReLU
        pos = 3
        for l in range(n_blocks):
            g_ref, w_ref = ins[pos], ins[pos + 1]
            gam_ref, bet_ref = ins[pos + 2], ins[pos + 3]
            pos += 4
            y = _gathered_conv(g_ref, w_ref, a)
            if y.shape[0] != r_outs[l]:
                y = y[: r_outs[l], :]
            # training-mode BN over all N*OH*OW rows, folded into one FMA
            mean = jnp.mean(y, axis=0, keepdims=True)
            var = jnp.mean(jnp.square(y - mean), axis=0, keepdims=True)
            scale = gam_ref[...] * jax.lax.rsqrt(var + eps)
            shift = bet_ref[...] - mean * scale
            y = y * scale + shift
            a = jnp.maximum(y, alpha * y)

        # ---- last layer: conv + bias + sigmoid
        g_ref, w_ref, b_ref = ins[pos], ins[pos + 1], ins[pos + 2]
        y = _gathered_conv(g_ref, w_ref, a)
        if y.shape[0] != r_outs[-1]:
            y = y[: r_outs[-1], :]
        out_ref[...] = jax.nn.sigmoid(y + b_ref[...])

    return kernel


# --------------------------------- model ------------------------------------

def init_discriminator_params(key, im_shape=(1, 16, 16), inner_feature=8):
    im_channel, im_size = im_shape[0], im_shape[-1]
    assert im_shape[-1] == im_shape[-2]
    n_inner_block = int(math.log2(im_size)) - 2
    assert 2 ** (n_inner_block + 2) == im_size

    keys = jax.random.split(key, 2 * (n_inner_block + 2))
    ki = iter(keys)

    def conv_w(k, cout, cin, ks=4):
        return 0.05 * jax.random.normal(k, (cout, cin, ks, ks), jnp.float32)

    params = {}
    params["w0"] = conv_w(next(ki), inner_feature, im_channel)
    params["b0"] = 0.05 * jax.random.normal(next(ki), (inner_feature,), jnp.float32)

    blocks = []
    for i in range(n_inner_block):
        cin = inner_feature * 2 ** i
        cout = inner_feature * 2 ** (i + 1)
        wconv = conv_w(next(ki), cout, cin)
        _ = next(ki)  # keep key consumption simple / deterministic
        gamma = jnp.ones((cout,), jnp.float32)   # PyTorch BN default init
        beta = jnp.zeros((cout,), jnp.float32)
        blocks.append((wconv, gamma, beta))
    params["blocks"] = blocks

    c_last_in = inner_feature * 2 ** n_inner_block
    params["w_last"] = conv_w(next(ki), 1, c_last_in)
    params["b_last"] = 0.05 * jax.random.normal(next(ki), (1,), jnp.float32)
    return params


def discriminator_forward(x, params):
    """x: (N, C, H, W) float32 -> (N, 1, 1, 1).  Single fused Pallas kernel."""
    n, c, h, w = x.shape
    n_blocks = len(params["blocks"])

    # Layer-0 patch gather on the raw input: one precomputed-index take().
    xpad = jnp.pad(x, ((0, 0), (0, 0), (1, 1), (1, 1)))
    p0 = xpad.reshape(-1)[_im2col_indices(n, c, h, w)]            # (N*OH*OW, C*16)

    f0 = params["w0"].shape[0]
    inputs = [
        p0,
        jnp.transpose(params["w0"].reshape(f0, -1), (1, 0)),       # (C*16, F0)
        params["b0"].reshape(1, -1),
    ]

    r_outs = []
    s = h // 2                     # spatial size of the activation feeding the next conv
    for (wconv, gamma, beta) in params["blocks"]:
        cout, cin = wconv.shape[0], wconv.shape[1]
        r_out = n * (s // 2) * (s // 2)
        r_blk = 8 * ((r_out + 7) // 8)
        inputs += [
            _conv_gather_taps_cat(n, s, r_blk),                           # (16*r_blk, n*s*s)
            jnp.transpose(wconv, (2, 3, 1, 0)).reshape(16, cin, cout),    # (16, Cin, Cout)
            gamma.reshape(1, -1),
            beta.reshape(1, -1),
        ]
        r_outs.append(r_out)
        s //= 2

    wl = params["w_last"]
    r_out = n * (s // 2) * (s // 2)
    r_blk = 8 * ((r_out + 7) // 8)
    inputs += [
        _conv_gather_taps_cat(n, s, r_blk),
        jnp.transpose(wl, (2, 3, 1, 0)).reshape(16, wl.shape[1], wl.shape[0]),
        params["b_last"].reshape(1, -1),
    ]
    r_outs.append(r_out)

    out = pl.pallas_call(
        _make_fused_kernel(n_blocks, tuple(r_outs)),
        out_shape=jax.ShapeDtypeStruct((n, 1), jnp.float32),
        in_specs=[_VMEM] * len(inputs),
        out_specs=_VMEM,
    )(*inputs)
    return out.reshape(n, 1, 1, 1)


# -------------------------- pure-JAX reference check -------------------------

def _reference_forward(x, params):
    def conv(z, wconv, b=None):
        y = jax.lax.conv_general_dilated(
            z, wconv, (2, 2), ((1, 1), (1, 1)),
            dimension_numbers=("NCHW", "OIHW", "NCHW"))
        if b is not None:
            y = y + b.reshape(1, -1, 1, 1)
        return y

    y = conv(x, params["w0"], params["b0"])
    y = jnp.where(y >= 0, y, 0.1 * y)
    for (wconv, gamma, beta) in params["blocks"]:
        y = conv(y, wconv)
        mean = jnp.mean(y, axis=(0, 2, 3), keepdims=True)
        var = jnp.mean((y - mean) ** 2, axis=(0, 2, 3), keepdims=True)
        y = (y - mean) * jax.lax.rsqrt(var + 1e-5)
        y = y * gamma.reshape(1, -1, 1, 1) + beta.reshape(1, -1, 1, 1)
        y = jnp.where(y >= 0, y, 0.2 * y)
    y = conv(y, params["w_last"], params["b_last"])
    return jax.nn.sigmoid(y)


# ----------------------------------- main ------------------------------------

if __name__ == "__main__":
    key = jax.random.PRNGKey(0)
    k_x, k_p = jax.random.split(key)

    im_shape = (1, 16, 16)
    inner_feature = 8
    batch = 2

    x = jax.random.normal(k_x, (batch,) + im_shape, jnp.float32)
    params = init_discriminator_params(k_p, im_shape, inner_feature)

    out = jax.jit(discriminator_forward)(x, params)
    out = jax.block_until_ready(out)

    ref = jax.jit(_reference_forward)(x, params)
    ref = jax.block_until_ready(ref)

    assert out.shape == (batch, 1, 1, 1), out.shape
    assert bool(jnp.all(jnp.isfinite(out)))
    assert bool(jnp.all((out >= 0.0) & (out <= 1.0)))      # sigmoid range
    err = float(jnp.max(jnp.abs(out - ref)))
    assert err < 2e-2, f"mismatch vs reference conv path: max|diff|={err}"
    print("KERNEL_OK")
</pallas_src>

<mosaic_0001>
module attributes {stable_mosaic.version = 11 : i64} {
  func.func @kernel(%arg0: memref<128x16xf32, #tpu.memory_space<vmem>>, %arg1: memref<16x8xf32, #tpu.memory_space<vmem>>, %arg2: memref<1x8xf32, #tpu.memory_space<vmem>>, %arg3: memref<512x128xf32, #tpu.memory_space<vmem>>, %arg4: memref<16x8x16xf32, #tpu.memory_space<vmem>>, %arg5: memref<1x16xf32, #tpu.memory_space<vmem>>, %arg6: memref<1x16xf32, #tpu.memory_space<vmem>>, %arg7: memref<128x32xf32, #tpu.memory_space<vmem>>, %arg8: memref<16x16x32xf32, #tpu.memory_space<vmem>>, %arg9: memref<1x32xf32, #tpu.memory_space<vmem>>, %arg10: memref<1x32xf32, #tpu.memory_space<vmem>>, %arg11: memref<128x8xf32, #tpu.memory_space<vmem>>, %arg12: memref<16x32x1xf32, #tpu.memory_space<vmem>>, %arg13: memref<1x1xf32, #tpu.memory_space<vmem>>, %arg14: memref<2x1xf32, #tpu.memory_space<vmem>>) attributes {dimension_semantics = [], scalar_prefetch = 0 : i64, scratch_operands = 0 : i64, tpu.core_type = #tpu.core_type<tc>} {
    %c0 = arith.constant 0 : index
    %c0_0 = arith.constant 0 : index
    %0 = vector.load %arg0[%c0, %c0_0] : memref<128x16xf32, #tpu.memory_space<vmem>>, vector<128x16xf32>
    %c0_1 = arith.constant 0 : index
    %c0_2 = arith.constant 0 : index
    %1 = vector.load %arg1[%c0_1, %c0_2] : memref<16x8xf32, #tpu.memory_space<vmem>>, vector<16x8xf32>
    %cst = arith.constant dense<0.000000e+00> : vector<128x8xf32>
    %2 = tpu.matmul %0, %1, %cst {dimension_numbers = #tpu.dot_dimension_numbers<[1], [0], [0], [1], [0, 0, 1, 1], [], []>} : vector<128x16xf32>, vector<16x8xf32>, vector<128x8xf32> -> vector<128x8xf32>
    %c0_3 = arith.constant 0 : index
    %c0_4 = arith.constant 0 : index
    %3 = vector.load %arg2[%c0_3, %c0_4] : memref<1x8xf32, #tpu.memory_space<vmem>>, vector<1x8xf32>
    %4 = vector.broadcast %3 : vector<1x8xf32> to vector<128x8xf32>
    %5 = arith.addf %2, %4 : vector<128x8xf32>
    %cst_5 = arith.constant 1.000000e-01 : f32
    %6 = vector.broadcast %cst_5 : f32 to vector<128x8xf32>
    %7 = arith.mulf %6, %5 : vector<128x8xf32>
    %8 = arith.maximumf %5, %7 : vector<128x8xf32>
    %c0_6 = arith.constant 0 : index
    %c0_7 = arith.constant 0 : index
    %9 = vector.load %arg3[%c0_6, %c0_7] : memref<512x128xf32, #tpu.memory_space<vmem>>, vector<512x128xf32>
    %cst_8 = arith.constant dense<0.000000e+00> : vector<512x8xf32>
    %10 = tpu.matmul %9, %8, %cst_8 {dimension_numbers = #tpu.dot_dimension_numbers<[1], [0], [0], [1], [0, 0, 1, 1], [], []>} : vector<512x128xf32>, vector<128x8xf32>, vector<512x8xf32> -> vector<512x8xf32>
    %11 = vector.extract_strided_slice %10 {offsets = [0, 0], sizes = [32, 8], strides = [1, 1]} : vector<512x8xf32> to vector<32x8xf32>
    %c0_9 = arith.constant 0 : index
    %c0_10 = arith.constant 0 : index
    %c0_11 = arith.constant 0 : index
    %12 = vector.load %arg4[%c0_9, %c0_10, %c0_11] : memref<16x8x16xf32, #tpu.memory_space<vmem>>, vector<1x8x16xf32>
    %13 = vector.shape_cast %12 : vector<1x8x16xf32> to vector<8x16xf32>
    %cst_12 = arith.constant dense<0.000000e+00> : vector<32x16xf32>
    %14 = tpu.matmul %11, %13, %cst_12 {dimension_numbers = #tpu.dot_dimension_numbers<[1], [0], [0], [1], [0, 0, 1, 1], [], []>} : vector<32x8xf32>, vector<8x16xf32>, vector<32x16xf32> -> vector<32x16xf32>
    %15 = vector.extract_strided_slice %10 {offsets = [32, 0], sizes = [32, 8], strides = [1, 1]} : vector<512x8xf32> to vector<32x8xf32>
    %c1 = arith.constant 1 : index
    %c0_13 = arith.constant 0 : index
    %c0_14 = arith.constant 0 : index
    %16 = vector.load %arg4[%c1, %c0_13, %c0_14] : memref<16x8x16xf32, #tpu.memory_space<vmem>>, vector<1x8x16xf32>
    %17 = vector.shape_cast %16 : vector<1x8x16xf32> to vector<8x16xf32>
    %cst_15 = arith.constant dense<0.000000e+00> : vector<32x16xf32>
    %18 = tpu.matmul %15, %17, %cst_15 {dimension_numbers = #tpu.dot_dimension_numbers<[1], [0], [0], [1], [0, 0, 1, 1], [], []>} : vector<32x8xf32>, vector<8x16xf32>, vector<32x16xf32> -> vector<32x16xf32>
    %19 = arith.addf %14, %18 : vector<32x16xf32>
    %20 = vector.extract_strided_slice %10 {offsets = [64, 0], sizes = [32, 8], strides = [1, 1]} : vector<512x8xf32> to vector<32x8xf32>
    %c2 = arith.constant 2 : index
    %c0_16 = arith.constant 0 : index
    %c0_17 = arith.constant 0 : index
    %21 = vector.load %arg4[%c2, %c0_16, %c0_17] : memref<16x8x16xf32, #tpu.memory_space<vmem>>, vector<1x8x16xf32>
    %22 = vector.shape_cast %21 : vector<1x8x16xf32> to vector<8x16xf32>
    %cst_18 = arith.constant dense<0.000000e+00> : vector<32x16xf32>
    %23 = tpu.matmul %20, %22, %cst_18 {dimension_numbers = #tpu.dot_dimension_numbers<[1], [0], [0], [1], [0, 0, 1, 1], [], []>} : vector<32x8xf32>, vector<8x16xf32>, vector<32x16xf32> -> vector<32x16xf32>
    %24 = arith.addf %19, %23 : vector<32x16xf32>
    %25 = vector.extract_strided_slice %10 {offsets = [96, 0], sizes = [32, 8], strides = [1, 1]} : vector<512x8xf32> to vector<32x8xf32>
    %c3 = arith.constant 3 : index
    %c0_19 = arith.constant 0 : index
    %c0_20 = arith.constant 0 : index
    %26 = vector.load %arg4[%c3, %c0_19, %c0_20] : memref<16x8x16xf32, #tpu.memory_space<vmem>>, vector<1x8x16xf32>
    %27 = vector.shape_cast %26 : vector<1x8x16xf32> to vector<8x16xf32>
    %cst_21 = arith.constant dense<0.000000e+00> : vector<32x16xf32>
    %28 = tpu.matmul %25, %27, %cst_21 {dimension_numbers = #tpu.dot_dimension_numbers<[1], [0], [0], [1], [0, 0, 1, 1], [], []>} : vector<32x8xf32>, vector<8x16xf32>, vector<32x16xf32> -> vector<32x16xf32>
    %29 = arith.addf %24, %28 : vector<32x16xf32>
    %30 = vector.extract_strided_slice %10 {offsets = [128, 0], sizes = [32, 8], strides = [1, 1]} : vector<512x8xf32> to vector<32x8xf32>
    %c4 = arith.constant 4 : index
    %c0_22 = arith.constant 0 : index
    %c0_23 = arith.constant 0 : index
    %31 = vector.load %arg4[%c4, %c0_22, %c0_23] : memref<16x8x16xf32, #tpu.memory_space<vmem>>, vector<1x8x16xf32>
    %32 = vector.shape_cast %31 : vector<1x8x16xf32> to vector<8x16xf32>
    %cst_24 = arith.constant dense<0.000000e+00> : vector<32x16xf32>
    %33 = tpu.matmul %30, %32, %cst_24 {dimension_numbers = #tpu.dot_dimension_numbers<[1], [0], [0], [1], [0, 0, 1, 1], [], []>} : vector<32x8xf32>, vector<8x16xf32>, vector<32x16xf32> -> vector<32x16xf32>
    %34 = arith.addf %29, %33 : vector<32x16xf32>
    %35 = vector.extract_strided_slice %10 {offsets = [160, 0], sizes = [32, 8], strides = [1, 1]} : vector<512x8xf32> to vector<32x8xf32>
    %c5 = arith.constant 5 : index
    %c0_25 = arith.constant 0 : index
    %c0_26 = arith.constant 0 : index
    %36 = vector.load %arg4[%c5, %c0_25, %c0_26] : memref<16x8x16xf32, #tpu.memory_space<vmem>>, vector<1x8x16xf32>
    %37 = vector.shape_cast %36 : vector<1x8x16xf32> to vector<8x16xf32>
    %cst_27 = arith.constant dense<0.000000e+00> : vector<32x16xf32>
    %38 = tpu.matmul %35, %37, %cst_27 {dimension_numbers = #tpu.dot_dimension_numbers<[1], [0], [0], [1], [0, 0, 1, 1], [], []>} : vector<32x8xf32>, vector<8x16xf32>, vector<32x16xf32> -> vector<32x16xf32>
    %39 = arith.addf %34, %38 : vector<32x16xf32>
    %40 = vector.extract_strided_slice %10 {offsets = [192, 0], sizes = [32, 8], strides = [1, 1]} : vector<512x8xf32> to vector<32x8xf32>
    %c6 = arith.constant 6 : index
    %c0_28 = arith.constant 0 : index
    %c0_29 = arith.constant 0 : index
    %41 = vector.load %arg4[%c6, %c0_28, %c0_29] : memref<16x8x16xf32, #tpu.memory_space<vmem>>, vector<1x8x16xf32>
    %42 = vector.shape_cast %41 : vector<1x8x16xf32> to vector<8x16xf32>
    %cst_30 = arith.constant dense<0.000000e+00> : vector<32x16xf32>
    %43 = tpu.matmul %40, %42, %cst_30 {dimension_numbers = #tpu.dot_dimension_numbers<[1], [0], [0], [1], [0, 0, 1, 1], [], []>} : vector<32x8xf32>, vector<8x16xf32>, vector<32x16xf32> -> vector<32x16xf32>
    %44 = arith.addf %39, %43 : vector<32x16xf32>
    %45 = vector.extract_strided_slice %10 {offsets = [224, 0], sizes = [32, 8], strides = [1, 1]} : vector<512x8xf32> to vector<32x8xf32>
    %c7 = arith.constant 7 : index
    %c0_31 = arith.constant 0 : index
    %c0_32 = arith.constant 0 : index
    %46 = vector.load %arg4[%c7, %c0_31, %c0_32] : memref<16x8x16xf32, #tpu.memory_space<vmem>>, vector<1x8x16xf32>
    %47 = vector.shape_cast %46 : vector<1x8x16xf32> to vector<8x16xf32>
    %cst_33 = arith.constant dense<0.000000e+00> : vector<32x16xf32>
    %48 = tpu.matmul %45, %47, %cst_33 {dimension_numbers = #tpu.dot_dimension_numbers<[1], [0], [0], [1], [0, 0, 1, 1], [], []>} : vector<32x8xf32>, vector<8x16xf32>, vector<32x16xf32> -> vector<32x16xf32>
    %49 = arith.addf %44, %48 : vector<32x16xf32>
    %50 = vector.extract_strided_slice %10 {offsets = [256, 0], sizes = [32, 8], strides = [1, 1]} : vector<512x8xf32> to vector<32x8xf32>
    %c8 = arith.constant 8 : index
    %c0_34 = arith.constant 0 : index
    %c0_35 = arith.constant 0 : index
    %51 = vector.load %arg4[%c8, %c0_34, %c0_35] : memref<16x8x16xf32, #tpu.memory_space<vmem>>, vector<1x8x16xf32>
    %52 = vector.shape_cast %51 : vector<1x8x16xf32> to vector<8x16xf32>
    %cst_36 = arith.constant dense<0.000000e+00> : vector<32x16xf32>
    %53 = tpu.matmul %50, %52, %cst_36 {dimension_numbers = #tpu.dot_dimension_numbers<[1], [0], [0], [1], [0, 0, 1, 1], [], []>} : vector<32x8xf32>, vector<8x16xf32>, vector<32x16xf32> -> vector<32x16xf32>
    %54 = arith.addf %49, %53 : vector<32x16xf32>
    %55 = vector.extract_strided_slice %10 {offsets = [288, 0], sizes = [32, 8], strides = [1, 1]} : vector<512x8xf32> to vector<32x8xf32>
    %c9 = arith.constant 9 : index
    %c0_37 = arith.constant 0 : index
    %c0_38 = arith.constant 0 : index
    %56 = vector.load %arg4[%c9, %c0_37, %c0_38] : memref<16x8x16xf32, #tpu.memory_space<vmem>>, vector<1x8x16xf32>
    %57 = vector.shape_cast %56 : vector<1x8x16xf32> to vector<8x16xf32>
    %cst_39 = arith.constant dense<0.000000e+00> : vector<32x16xf32>
    %58 = tpu.matmul %55, %57, %cst_39 {dimension_numbers = #tpu.dot_dimension_numbers<[1], [0], [0], [1], [0, 0, 1, 1], [], []>} : vector<32x8xf32>, vector<8x16xf32>, vector<32x16xf32> -> vector<32x16xf32>
    %59 = arith.addf %54, %58 : vector<32x16xf32>
    %60 = vector.extract_strided_slice %10 {offsets = [320, 0], sizes = [32, 8], strides = [1, 1]} : vector<512x8xf32> to vector<32x8xf32>
    %c10 = arith.constant 10 : index
    %c0_40 = arith.constant 0 : index
    %c0_41 = arith.constant 0 : index
    %61 = vector.load %arg4[%c10, %c0_40, %c0_41] : memref<16x8x16xf32, #tpu.memory_space<vmem>>, vector<1x8x16xf32>
    %62 = vector.shape_cast %61 : vector<1x8x16xf32> to vector<8x16xf32>
    %cst_42 = arith.constant dense<0.000000e+00> : vector<32x16xf32>
    %63 = tpu.matmul %60, %62, %cst_42 {dimension_numbers = #tpu.dot_dimension_numbers<[1], [0], [0], [1], [0, 0, 1, 1], [], []>} : vector<32x8xf32>, vector<8x16xf32>, vector<32x16xf32> -> vector<32x16xf32>
    %64 = arith.addf %59, %63 : vector<32x16xf32>
    %65 = vector.extract_strided_slice %10 {offsets = [352, 0], sizes = [32, 8], strides = [1, 1]} : vector<512x8xf32> to vector<32x8xf32>
    %c11 = arith.constant 11 : index
    %c0_43 = arith.constant 0 : index
    %c0_44 = arith.constant 0 : index
    %66 = vector.load %arg4[%c11, %c0_43, %c0_44] : memref<16x8x16xf32, #tpu.memory_space<vmem>>, vector<1x8x16xf32>
    %67 = vector.shape_cast %66 : vector<1x8x16xf32> to vector<8x16xf32>
    %cst_45 = arith.constant dense<0.000000e+00> : vector<32x16xf32>
    %68 = tpu.matmul %65, %67, %cst_45 {dimension_numbers = #tpu.dot_dimension_numbers<[1], [0], [0], [1], [0, 0, 1, 1], [], []>} : vector<32x8xf32>, vector<8x16xf32>, vector<32x16xf32> -> vector<32x16xf32>
    %69 = arith.addf %64, %68 : vector<32x16xf32>
    %70 = vector.extract_strided_slice %10 {offsets = [384, 0], sizes = [32, 8], strides = [1, 1]} : vector<512x8xf32> to vector<32x8xf32>
    %c12 = arith.constant 12 : index
    %c0_46 = arith.constant 0 : index
    %c0_47 = arith.constant 0 : index
    %71 = vector.load %arg4[%c12, %c0_46, %c0_47] : memref<16x8x16xf32, #tpu.memory_space<vmem>>, vector<1x8x16xf32>
    %72 = vector.shape_cast %71 : vector<1x8x16xf32> to vector<8x16xf32>
    %cst_48 = arith.constant dense<0.000000e+00> : vector<32x16xf32>
    %73 = tpu.matmul %70, %72, %cst_48 {dimension_numbers = #tpu.dot_dimension_numbers<[1], [0], [0], [1], [0, 0, 1, 1], [], []>} : vector<32x8xf32>, vector<8x16xf32>, vector<32x16xf32> -> vector<32x16xf32>
    %74 = arith.addf %69, %73 : vector<32x16xf32>
    %75 = vector.extract_strided_slice %10 {offsets = [416, 0], sizes = [32, 8], strides = [1, 1]} : vector<512x8xf32> to vector<32x8xf32>
    %c13 = arith.constant 13 : index
    %c0_49 = arith.constant 0 : index
    %c0_50 = arith.constant 0 : index
    %76 = vector.load %arg4[%c13, %c0_49, %c0_50] : memref<16x8x16xf32, #tpu.memory_space<vmem>>, vector<1x8x16xf32>
    %77 = vector.shape_cast %76 : vector<1x8x16xf32> to vector<8x16xf32>
    %cst_51 = arith.constant dense<0.000000e+00> : vector<32x16xf32>
    %78 = tpu.matmul %75, %77, %cst_51 {dimension_numbers = #tpu.dot_dimension_numbers<[1], [0], [0], [1], [0, 0, 1, 1], [], []>} : vector<32x8xf32>, vector<8x16xf32>, vector<32x16xf32> -> vector<32x16xf32>
    %79 = arith.addf %74, %78 : vector<32x16xf32>
    %80 = vector.extract_strided_slice %10 {offsets = [448, 0], sizes = [32, 8], strides = [1, 1]} : vector<512x8xf32> to vector<32x8xf32>
    %c14 = arith.constant 14 : index
    %c0_52 = arith.constant 0 : index
    %c0_53 = arith.constant 0 : index
    %81 = vector.load %arg4[%c14, %c0_52, %c0_53] : memref<16x8x16xf32, #tpu.memory_space<vmem>>, vector<1x8x16xf32>
    %82 = vector.shape_cast %81 : vector<1x8x16xf32> to vector<8x16xf32>
    %cst_54 = arith.constant dense<0.000000e+00> : vector<32x16xf32>
    %83 = tpu.matmul %80, %82, %cst_54 {dimension_numbers = #tpu.dot_dimension_numbers<[1], [0], [0], [1], [0, 0, 1, 1], [], []>} : vector<32x8xf32>, vector<8x16xf32>, vector<32x16xf32> -> vector<32x16xf32>
    %84 = arith.addf %79, %83 : vector<32x16xf32>
    %85 = vector.extract_strided_slice %10 {offsets = [480, 0], sizes = [32, 8], strides = [1, 1]} : vector<512x8xf32> to vector<32x8xf32>
    %c15 = arith.constant 15 : index
    %c0_55 = arith.constant 0 : index
    %c0_56 = arith.constant 0 : index
    %86 = vector.load %arg4[%c15, %c0_55, %c0_56] : memref<16x8x16xf32, #tpu.memory_space<vmem>>, vector<1x8x16xf32>
    %87 = vector.shape_cast %86 : vector<1x8x16xf32> to vector<8x16xf32>
    %cst_57 = arith.constant dense<0.000000e+00> : vector<32x16xf32>
    %88 = tpu.matmul %85, %87, %cst_57 {dimension_numbers = #tpu.dot_dimension_numbers<[1], [0], [0], [1], [0, 0, 1, 1], [], []>} : vector<32x8xf32>, vector<8x16xf32>, vector<32x16xf32> -> vector<32x16xf32>
    %89 = arith.addf %84, %88 : vector<32x16xf32>
    %cst_58 = arith.constant dense<0.000000e+00> : vector<16xf32>
    %90 = vector.multi_reduction <add>, %89, %cst_58 [0] : vector<32x16xf32> to vector<16xf32>
    %91 = vector.shape_cast %90 : vector<16xf32> to vector<1x16xf32>
    %cst_59 = arith.constant 3.200000e+01 : f32
    %92 = vector.broadcast %cst_59 : f32 to vector<1x16xf32>
    %93 = arith.divf %91, %92 : vector<1x16xf32>
    %94 = vector.broadcast %93 : vector<1x16xf32> to vector<32x16xf32>
    %95 = arith.subf %89, %94 : vector<32x16xf32>
    %96 = arith.mulf %95, %95 : vector<32x16xf32>
    %cst_60 = arith.constant dense<0.000000e+00> : vector<16xf32>
    %97 = vector.multi_reduction <add>, %96, %cst_60 [0] : vector<32x16xf32> to vector<16xf32>
    %98 = vector.shape_cast %97 : vector<16xf32> to vector<1x16xf32>
    %cst_61 = arith.constant 3.200000e+01 : f32
    %99 = vector.broadcast %cst_61 : f32 to vector<1x16xf32>
    %100 = arith.divf %98, %99 : vector<1x16xf32>
    %c0_62 = arith.constant 0 : index
    %c0_63 = arith.constant 0 : index
    %101 = vector.load %arg5[%c0_62, %c0_63] : memref<1x16xf32, #tpu.memory_space<vmem>>, vector<1x16xf32>
    %cst_64 = arith.constant 9.99999974E-6 : f32
    %102 = vector.broadcast %cst_64 : f32 to vector<1x16xf32>
    %103 = arith.addf %100, %102 : vector<1x16xf32>
    %104 = math.rsqrt %103 : vector<1x16xf32>
    %105 = arith.mulf %101, %104 : vector<1x16xf32>
    %c0_65 = arith.constant 0 : index
    %c0_66 = arith.constant 0 : index
    %106 = vector.load %arg6[%c0_65, %c0_66] : memref<1x16xf32, #tpu.memory_space<vmem>>, vector<1x16xf32>
    %107 = arith.mulf %93, %105 : vector<1x16xf32>
    %108 = arith.subf %106, %107 : vector<1x16xf32>
    %109 = vector.broadcast %105 : vector<1x16xf32> to vector<32x16xf32>
    %110 = arith.mulf %89, %109 : vector<32x16xf32>
    %111 = vector.broadcast %108 : vector<1x16xf32> to vector<32x16xf32>
    %112 = arith.addf %110, %111 : vector<32x16xf32>
    %cst_67 = arith.constant 2.000000e-01 : f32
    %113 = vector.broadcast %cst_67 : f32 to vector<32x16xf32>
    %114 = arith.mulf %113, %112 : vector<32x16xf32>
    %115 = arith.maximumf %112, %114 : vector<32x16xf32>
    %c0_68 = arith.constant 0 : index
    %c0_69 = arith.constant 0 : index
    %116 = vector.load %arg7[%c0_68, %c0_69] : memref<128x32xf32, #tpu.memory_space<vmem>>, vector<128x32xf32>
    %cst_70 = arith.constant dense<0.000000e+00> : vector<128x16xf32>
    %117 = tpu.matmul %116, %115, %cst_70 {dimension_numbers = #tpu.dot_dimension_numbers<[1], [0], [0], [1], [0, 0, 1, 1], [], []>} : vector<128x32xf32>, vector<32x16xf32>, vector<128x16xf32> -> vector<128x16xf32>
    %118 = vector.extract_strided_slice %117 {offsets = [0, 0], sizes = [8, 16], strides = [1, 1]} : vector<128x16xf32> to vector<8x16xf32>
    %c0_71 = arith.constant 0 : index
    %c0_72 = arith.constant 0 : index
    %c0_73 = arith.constant 0 : index
    %119 = vector.load %arg8[%c0_71, %c0_72, %c0_73] : memref<16x16x32xf32, #tpu.memory_space<vmem>>, vector<1x16x32xf32>
    %120 = vector.shape_cast %119 : vector<1x16x32xf32> to vector<16x32xf32>
    %cst_74 = arith.constant dense<0.000000e+00> : vector<8x32xf32>
    %121 = tpu.matmul %118, %120, %cst_74 {dimension_numbers = #tpu.dot_dimension_numbers<[1], [0], [0], [1], [0, 0, 1, 1], [], []>} : vector<8x16xf32>, vector<16x32xf32>, vector<8x32xf32> -> vector<8x32xf32>
    %122 = vector.extract_strided_slice %117 {offsets = [8, 0], sizes = [8, 16], strides = [1, 1]} : vector<128x16xf32> to vector<8x16xf32>
    %c1_75 = arith.constant 1 : index
    %c0_76 = arith.constant 0 : index
    %c0_77 = arith.constant 0 : index
    %123 = vector.load %arg8[%c1_75, %c0_76, %c0_77] : memref<16x16x32xf32, #tpu.memory_space<vmem>>, vector<1x16x32xf32>
    %124 = vector.shape_cast %123 : vector<1x16x32xf32> to vector<16x32xf32>
    %cst_78 = arith.constant dense<0.000000e+00> : vector<8x32xf32>
    %125 = tpu.matmul %122, %124, %cst_78 {dimension_numbers = #tpu.dot_dimension_numbers<[1], [0], [0], [1], [0, 0, 1, 1], [], []>} : vector<8x16xf32>, vector<16x32xf32>, vector<8x32xf32> -> vector<8x32xf32>
    %126 = arith.addf %121, %125 : vector<8x32xf32>
    %127 = vector.extract_strided_slice %117 {offsets = [16, 0], sizes = [8, 16], strides = [1, 1]} : vector<128x16xf32> to vector<8x16xf32>
    %c2_79 = arith.constant 2 : index
    %c0_80 = arith.constant 0 : index
    %c0_81 = arith.constant 0 : index
    %128 = vector.load %arg8[%c2_79, %c0_80, %c0_81] : memref<16x16x32xf32, #tpu.memory_space<vmem>>, vector<1x16x32xf32>
    %129 = vector.shape_cast %128 : vector<1x16x32xf32> to vector<16x32xf32>
    %cst_82 = arith.constant dense<0.000000e+00> : vector<8x32xf32>
    %130 = tpu.matmul %127, %129, %cst_82 {dimension_numbers = #tpu.dot_dimension_numbers<[1], [0], [0], [1], [0, 0, 1, 1], [], []>} : vector<8x16xf32>, vector<16x32xf32>, vector<8x32xf32> -> vector<8x32xf32>
    %131 = arith.addf %126, %130 : vector<8x32xf32>
    %132 = vector.extract_strided_slice %117 {offsets = [24, 0], sizes = [8, 16], strides = [1, 1]} : vector<128x16xf32> to vector<8x16xf32>
    %c3_83 = arith.constant 3 : index
    %c0_84 = arith.constant 0 : index
    %c0_85 = arith.constant 0 : index
    %133 = vector.load %arg8[%c3_83, %c0_84, %c0_85] : memref<16x16x32xf32, #tpu.memory_space<vmem>>, vector<1x16x32xf32>
    %134 = vector.shape_cast %133 : vector<1x16x32xf32> to vector<16x32xf32>
    %cst_86 = arith.constant dense<0.000000e+00> : vector<8x32xf32>
    %135 = tpu.matmul %132, %134, %cst_86 {dimension_numbers = #tpu.dot_dimension_numbers<[1], [0], [0], [1], [0, 0, 1, 1], [], []>} : vector<8x16xf32>, vector<16x32xf32>, vector<8x32xf32> -> vector<8x32xf32>
    %136 = arith.addf %131, %135 : vector<8x32xf32>
    %137 = vector.extract_strided_slice %117 {offsets = [32, 0], sizes = [8, 16], strides = [1, 1]} : vector<128x16xf32> to vector<8x16xf32>
    %c4_87 = arith.constant 4 : index
    %c0_88 = arith.constant 0 : index
    %c0_89 = arith.constant 0 : index
    %138 = vector.load %arg8[%c4_87, %c0_88, %c0_89] : memref<16x16x32xf32, #tpu.memory_space<vmem>>, vector<1x16x32xf32>
    %139 = vector.shape_cast %138 : vector<1x16x32xf32> to vector<16x32xf32>
    %cst_90 = arith.constant dense<0.000000e+00> : vector<8x32xf32>
    %140 = tpu.matmul %137, %139, %cst_90 {dimension_numbers = #tpu.dot_dimension_numbers<[1], [0], [0], [1], [0, 0, 1, 1], [], []>} : vector<8x16xf32>, vector<16x32xf32>, vector<8x32xf32> -> vector<8x32xf32>
    %141 = arith.addf %136, %140 : vector<8x32xf32>
    %142 = vector.extract_strided_slice %117 {offsets = [40, 0], sizes = [8, 16], strides = [1, 1]} : vector<128x16xf32> to vector<8x16xf32>
    %c5_91 = arith.constant 5 : index
    %c0_92 = arith.constant 0 : index
    %c0_93 = arith.constant 0 : index
    %143 = vector.load %arg8[%c5_91, %c0_92, %c0_93] : memref<16x16x32xf32, #tpu.memory_space<vmem>>, vector<1x16x32xf32>
    %144 = vector.shape_cast %143 : vector<1x16x32xf32> to vector<16x32xf32>
    %cst_94 = arith.constant dense<0.000000e+00> : vector<8x32xf32>
    %145 = tpu.matmul %142, %144, %cst_94 {dimension_numbers = #tpu.dot_dimension_numbers<[1], [0], [0], [1], [0, 0, 1, 1], [], []>} : vector<8x16xf32>, vector<16x32xf32>, vector<8x32xf32> -> vector<8x32xf32>
    %146 = arith.addf %141, %145 : vector<8x32xf32>
    %147 = vector.extract_strided_slice %117 {offsets = [48, 0], sizes = [8, 16], strides = [1, 1]} : vector<128x16xf32> to vector<8x16xf32>
    %c6_95 = arith.constant 6 : index
    %c0_96 = arith.constant 0 : index
    %c0_97 = arith.constant 0 : index
    %148 = vector.load %arg8[%c6_95, %c0_96, %c0_97] : memref<16x16x32xf32, #tpu.memory_space<vmem>>, vector<1x16x32xf32>
    %149 = vector.shape_cast %148 : vector<1x16x32xf32> to vector<16x32xf32>
    %cst_98 = arith.constant dense<0.000000e+00> : vector<8x32xf32>
    %150 = tpu.matmul %147, %149, %cst_98 {dimension_numbers = #tpu.dot_dimension_numbers<[1], [0], [0], [1], [0, 0, 1, 1], [], []>} : vector<8x16xf32>, vector<16x32xf32>, vector<8x32xf32> -> vector<8x32xf32>
    %151 = arith.addf %146, %150 : vector<8x32xf32>
    %152 = vector.extract_strided_slice %117 {offsets = [56, 0], sizes = [8, 16], strides = [1, 1]} : vector<128x16xf32> to vector<8x16xf32>
    %c7_99 = arith.constant 7 : index
    %c0_100 = arith.constant 0 : index
    %c0_101 = arith.constant 0 : index
    %153 = vector.load %arg8[%c7_99, %c0_100, %c0_101] : memref<16x16x32xf32, #tpu.memory_space<vmem>>, vector<1x16x32xf32>
    %154 = vector.shape_cast %153 : vector<1x16x32xf32> to vector<16x32xf32>
    %cst_102 = arith.constant dense<0.000000e+00> : vector<8x32xf32>
    %155 = tpu.matmul %152, %154, %cst_102 {dimension_numbers = #tpu.dot_dimension_numbers<[1], [0], [0], [1], [0, 0, 1, 1], [], []>} : vector<8x16xf32>, vector<16x32xf32>, vector<8x32xf32> -> vector<8x32xf32>
    %156 = arith.addf %151, %155 : vector<8x32xf32>
    %157 = vector.extract_strided_slice %117 {offsets = [64, 0], sizes = [8, 16], strides = [1, 1]} : vector<128x16xf32> to vector<8x16xf32>
    %c8_103 = arith.constant 8 : index
    %c0_104 = arith.constant 0 : index
    %c0_105 = arith.constant 0 : index
    %158 = vector.load %arg8[%c8_103, %c0_104, %c0_105] : memref<16x16x32xf32, #tpu.memory_space<vmem>>, vector<1x16x32xf32>
    %159 = vector.shape_cast %158 : vector<1x16x32xf32> to vector<16x32xf32>
    %cst_106 = arith.constant dense<0.000000e+00> : vector<8x32xf32>
    %160 = tpu.matmul %157, %159, %cst_106 {dimension_numbers = #tpu.dot_dimension_numbers<[1], [0], [0], [1], [0, 0, 1, 1], [], []>} : vector<8x16xf32>, vector<16x32xf32>, vector<8x32xf32> -> vector<8x32xf32>
    %161 = arith.addf %156, %160 : vector<8x32xf32>
    %162 = vector.extract_strided_slice %117 {offsets = [72, 0], sizes = [8, 16], strides = [1, 1]} : vector<128x16xf32> to vector<8x16xf32>
    %c9_107 = arith.constant 9 : index
    %c0_108 = arith.constant 0 : index
    %c0_109 = arith.constant 0 : index
    %163 = vector.load %arg8[%c9_107, %c0_108, %c0_109] : memref<16x16x32xf32, #tpu.memory_space<vmem>>, vector<1x16x32xf32>
    %164 = vector.shape_cast %163 : vector<1x16x32xf32> to vector<16x32xf32>
    %cst_110 = arith.constant dense<0.000000e+00> : vector<8x32xf32>
    %165 = tpu.matmul %162, %164, %cst_110 {dimension_numbers = #tpu.dot_dimension_numbers<[1], [0], [0], [1], [0, 0, 1, 1], [], []>} : vector<8x16xf32>, vector<16x32xf32>, vector<8x32xf32> -> vector<8x32xf32>
    %166 = arith.addf %161, %165 : vector<8x32xf32>
    %167 = vector.extract_strided_slice %117 {offsets = [80, 0], sizes = [8, 16], strides = [1, 1]} : vector<128x16xf32> to vector<8x16xf32>
    %c10_111 = arith.constant 10 : index
    %c0_112 = arith.constant 0 : index
    %c0_113 = arith.constant 0 : index
    %168 = vector.load %arg8[%c10_111, %c0_112, %c0_113] : memref<16x16x32xf32, #tpu.memory_space<vmem>>, vector<1x16x32xf32>
    %169 = vector.shape_cast %168 : vector<1x16x32xf32> to vector<16x32xf32>
    %cst_114 = arith.constant dense<0.000000e+00> : vector<8x32xf32>
    %170 = tpu.matmul %167, %169, %cst_114 {dimension_numbers = #tpu.dot_dimension_numbers<[1], [0], [0], [1], [0, 0, 1, 1], [], []>} : vector<8x16xf32>, vector<16x32xf32>, vector<8x32xf32> -> vector<8x32xf32>
    %171 = arith.addf %166, %170 : vector<8x32xf32>
    %172 = vector.extract_strided_slice %117 {offsets = [88, 0], sizes = [8, 16], strides = [1, 1]} : vector<128x16xf32> to vector<8x16xf32>
    %c11_115 = arith.constant 11 : index
    %c0_116 = arith.constant 0 : index
    %c0_117 = arith.constant 0 : index
    %173 = vector.load %arg8[%c11_115, %c0_116, %c0_117] : memref<16x16x32xf32, #tpu.memory_space<vmem>>, vector<1x16x32xf32>
    %174 = vector.shape_cast %173 : vector<1x16x32xf32> to vector<16x32xf32>
    %cst_118 = arith.constant dense<0.000000e+00> : vector<8x32xf32>
    %175 = tpu.matmul %172, %174, %cst_118 {dimension_numbers = #tpu.dot_dimension_numbers<[1], [0], [0], [1], [0, 0, 1, 1], [], []>} : vector<8x16xf32>, vector<16x32xf32>, vector<8x32xf32> -> vector<8x32xf32>
    %176 = arith.addf %171, %175 : vector<8x32xf32>
    %177 = vector.extract_strided_slice %117 {offsets = [96, 0], sizes = [8, 16], strides = [1, 1]} : vector<128x16xf32> to vector<8x16xf32>
    %c12_119 = arith.constant 12 : index
    %c0_120 = arith.constant 0 : index
    %c0_121 = arith.constant 0 : index
    %178 = vector.load %arg8[%c12_119, %c0_120, %c0_121] : memref<16x16x32xf32, #tpu.memory_space<vmem>>, vector<1x16x32xf32>
    %179 = vector.shape_cast %178 : vector<1x16x32xf32> to vector<16x32xf32>
    %cst_122 = arith.constant dense<0.000000e+00> : vector<8x32xf32>
    %180 = tpu.matmul %177, %179, %cst_122 {dimension_numbers = #tpu.dot_dimension_numbers<[1], [0], [0], [1], [0, 0, 1, 1], [], []>} : vector<8x16xf32>, vector<16x32xf32>, vector<8x32xf32> -> vector<8x32xf32>
    %181 = arith.addf %176, %180 : vector<8x32xf32>
    %182 = vector.extract_strided_slice %117 {offsets = [104, 0], sizes = [8, 16], strides = [1, 1]} : vector<128x16xf32> to vector<8x16xf32>
    %c13_123 = arith.constant 13 : index
    %c0_124 = arith.constant 0 : index
    %c0_125 = arith.constant 0 : index
    %183 = vector.load %arg8[%c13_123, %c0_124, %c0_125] : memref<16x16x32xf32, #tpu.memory_space<vmem>>, vector<1x16x32xf32>
    %184 = vector.shape_cast %183 : vector<1x16x32xf32> to vector<16x32xf32>
    %cst_126 = arith.constant dense<0.000000e+00> : vector<8x32xf32>
    %185 = tpu.matmul %182, %184, %cst_126 {dimension_numbers = #tpu.dot_dimension_numbers<[1], [0], [0], [1], [0, 0, 1, 1], [], []>} : vector<8x16xf32>, vector<16x32xf32>, vector<8x32xf32> -> vector<8x32xf32>
    %186 = arith.addf %181, %185 : vector<8x32xf32>
    %187 = vector.extract_strided_slice %117 {offsets = [112, 0], sizes = [8, 16], strides = [1, 1]} : vector<128x16xf32> to vector<8x16xf32>
    %c14_127 = arith.constant 14 : index
    %c0_128 = arith.constant 0 : index
    %c0_129 = arith.constant 0 : index
    %188 = vector.load %arg8[%c14_127, %c0_128, %c0_129] : memref<16x16x32xf32, #tpu.memory_space<vmem>>, vector<1x16x32xf32>
    %189 = vector.shape_cast %188 : vector<1x16x32xf32> to vector<16x32xf32>
    %cst_130 = arith.constant dense<0.000000e+00> : vector<8x32xf32>
    %190 = tpu.matmul %187, %189, %cst_130 {dimension_numbers = #tpu.dot_dimension_numbers<[1], [0], [0], [1], [0, 0, 1, 1], [], []>} : vector<8x16xf32>, vector<16x32xf32>, vector<8x32xf32> -> vector<8x32xf32>
    %191 = arith.addf %186, %190 : vector<8x32xf32>
    %192 = vector.extract_strided_slice %117 {offsets = [120, 0], sizes = [8, 16], strides = [1, 1]} : vector<128x16xf32> to vector<8x16xf32>
    %c15_131 = arith.constant 15 : index
    %c0_132 = arith.constant 0 : index
    %c0_133 = arith.constant 0 : index
    %193 = vector.load %arg8[%c15_131, %c0_132, %c0_133] : memref<16x16x32xf32, #tpu.memory_space<vmem>>, vector<1x16x32xf32>
    %194 = vector.shape_cast %193 : vector<1x16x32xf32> to vector<16x32xf32>
    %cst_134 = arith.constant dense<0.000000e+00> : vector<8x32xf32>
    %195 = tpu.matmul %192, %194, %cst_134 {dimension_numbers = #tpu.dot_dimension_numbers<[1], [0], [0], [1], [0, 0, 1, 1], [], []>} : vector<8x16xf32>, vector<16x32xf32>, vector<8x32xf32> -> vector<8x32xf32>
    %196 = arith.addf %191, %195 : vector<8x32xf32>
    %cst_135 = arith.constant dense<0.000000e+00> : vector<32xf32>
    %197 = vector.multi_reduction <add>, %196, %cst_135 [0] : vector<8x32xf32> to vector<32xf32>
    %198 = vector.shape_cast %197 : vector<32xf32> to vector<1x32xf32>
    %cst_136 = arith.constant 8.000000e+00 : f32
    %199 = vector.broadcast %cst_136 : f32 to vector<1x32xf32>
    %200 = arith.divf %198, %199 : vector<1x32xf32>
    %201 = vector.broadcast %200 : vector<1x32xf32> to vector<8x32xf32>
    %202 = arith.subf %196, %201 : vector<8x32xf32>
    %203 = arith.mulf %202, %202 : vector<8x32xf32>
    %cst_137 = arith.constant dense<0.000000e+00> : vector<32xf32>
    %204 = vector.multi_reduction <add>, %203, %cst_137 [0] : vector<8x32xf32> to vector<32xf32>
    %205 = vector.shape_cast %204 : vector<32xf32> to vector<1x32xf32>
    %cst_138 = arith.constant 8.000000e+00 : f32
    %206 = vector.broadcast %cst_138 : f32 to vector<1x32xf32>
    %207 = arith.divf %205, %206 : vector<1x32xf32>
    %c0_139 = arith.constant 0 : index
    %c0_140 = arith.constant 0 : index
    %208 = vector.load %arg9[%c0_139, %c0_140] : memref<1x32xf32, #tpu.memory_space<vmem>>, vector<1x32xf32>
    %cst_141 = arith.constant 9.99999974E-6 : f32
    %209 = vector.broadcast %cst_141 : f32 to vector<1x32xf32>
    %210 = arith.addf %207, %209 : vector<1x32xf32>
    %211 = math.rsqrt %210 : vector<1x32xf32>
    %212 = arith.mulf %208, %211 : vector<1x32xf32>
    %c0_142 = arith.constant 0 : index
    %c0_143 = arith.constant 0 : index
    %213 = vector.load %arg10[%c0_142, %c0_143] : memref<1x32xf32, #tpu.memory_space<vmem>>, vector<1x32xf32>
    %214 = arith.mulf %200, %212 : vector<1x32xf32>
    %215 = arith.subf %213, %214 : vector<1x32xf32>
    %216 = vector.broadcast %212 : vector<1x32xf32> to vector<8x32xf32>
    %217 = arith.mulf %196, %216 : vector<8x32xf32>
    %218 = vector.broadcast %215 : vector<1x32xf32> to vector<8x32xf32>
    %219 = arith.addf %217, %218 : vector<8x32xf32>
    %cst_144 = arith.constant 2.000000e-01 : f32
    %220 = vector.broadcast %cst_144 : f32 to vector<8x32xf32>
    %221 = arith.mulf %220, %219 : vector<8x32xf32>
    %222 = arith.maximumf %219, %221 : vector<8x32xf32>
    %c0_145 = arith.constant 0 : index
    %c0_146 = arith.constant 0 : index
    %223 = vector.load %arg11[%c0_145, %c0_146] : memref<128x8xf32, #tpu.memory_space<vmem>>, vector<128x8xf32>
    %cst_147 = arith.constant dense<0.000000e+00> : vector<128x32xf32>
    %224 = tpu.matmul %223, %222, %cst_147 {dimension_numbers = #tpu.dot_dimension_numbers<[1], [0], [0], [1], [0, 0, 1, 1], [], []>} : vector<128x8xf32>, vector<8x32xf32>, vector<128x32xf32> -> vector<128x32xf32>
    %225 = vector.extract_strided_slice %224 {offsets = [0, 0], sizes = [8, 32], strides = [1, 1]} : vector<128x32xf32> to vector<8x32xf32>
    %c0_148 = arith.constant 0 : index
    %c0_149 = arith.constant 0 : index
    %c0_150 = arith.constant 0 : index
    %226 = vector.load %arg12[%c0_148, %c0_149, %c0_150] : memref<16x32x1xf32, #tpu.memory_space<vmem>>, vector<1x32x1xf32>
    %227 = vector.shape_cast %226 : vector<1x32x1xf32> to vector<32x1xf32>
    %cst_151 = arith.constant dense<0.000000e+00> : vector<8x1xf32>
    %228 = tpu.matmul %225, %227, %cst_151 {dimension_numbers = #tpu.dot_dimension_numbers<[1], [0], [0], [1], [0, 0, 1, 1], [], []>} : vector<8x32xf32>, vector<32x1xf32>, vector<8x1xf32> -> vector<8x1xf32>
    %229 = vector.extract_strided_slice %224 {offsets = [8, 0], sizes = [8, 32], strides = [1, 1]} : vector<128x32xf32> to vector<8x32xf32>
    %c1_152 = arith.constant 1 : index
    %c0_153 = arith.constant 0 : index
    %c0_154 = arith.constant 0 : index
    %230 = vector.load %arg12[%c1_152, %c0_153, %c0_154] : memref<16x32x1xf32, #tpu.memory_space<vmem>>, vector<1x32x1xf32>
    %231 = vector.shape_cast %230 : vector<1x32x1xf32> to vector<32x1xf32>
    %cst_155 = arith.constant dense<0.000000e+00> : vector<8x1xf32>
    %232 = tpu.matmul %229, %231, %cst_155 {dimension_numbers = #tpu.dot_dimension_numbers<[1], [0], [0], [1], [0, 0, 1, 1], [], []>} : vector<8x32xf32>, vector<32x1xf32>, vector<8x1xf32> -> vector<8x1xf32>
    %233 = arith.addf %228, %232 : vector<8x1xf32>
    %234 = vector.extract_strided_slice %224 {offsets = [16, 0], sizes = [8, 32], strides = [1, 1]} : vector<128x32xf32> to vector<8x32xf32>
    %c2_156 = arith.constant 2 : index
    %c0_157 = arith.constant 0 : index
    %c0_158 = arith.constant 0 : index
    %235 = vector.load %arg12[%c2_156, %c0_157, %c0_158] : memref<16x32x1xf32, #tpu.memory_space<vmem>>, vector<1x32x1xf32>
    %236 = vector.shape_cast %235 : vector<1x32x1xf32> to vector<32x1xf32>
    %cst_159 = arith.constant dense<0.000000e+00> : vector<8x1xf32>
    %237 = tpu.matmul %234, %236, %cst_159 {dimension_numbers = #tpu.dot_dimension_numbers<[1], [0], [0], [1], [0, 0, 1, 1], [], []>} : vector<8x32xf32>, vector<32x1xf32>, vector<8x1xf32> -> vector<8x1xf32>
    %238 = arith.addf %233, %237 : vector<8x1xf32>
    %239 = vector.extract_strided_slice %224 {offsets = [24, 0], sizes = [8, 32], strides = [1, 1]} : vector<128x32xf32> to vector<8x32xf32>
    %c3_160 = arith.constant 3 : index
    %c0_161 = arith.constant 0 : index
    %c0_162 = arith.constant 0 : index
    %240 = vector.load %arg12[%c3_160, %c0_161, %c0_162] : memref<16x32x1xf32, #tpu.memory_space<vmem>>, vector<1x32x1xf32>
    %241 = vector.shape_cast %240 : vector<1x32x1xf32> to vector<32x1xf32>
    %cst_163 = arith.constant dense<0.000000e+00> : vector<8x1xf32>
    %242 = tpu.matmul %239, %241, %cst_163 {dimension_numbers = #tpu.dot_dimension_numbers<[1], [0], [0], [1], [0, 0, 1, 1], [], []>} : vector<8x32xf32>, vector<32x1xf32>, vector<8x1xf32> -> vector<8x1xf32>
    %243 = arith.addf %238, %242 : vector<8x1xf32>
    %244 = vector.extract_strided_slice %224 {offsets = [32, 0], sizes = [8, 32], strides = [1, 1]} : vector<128x32xf32> to vector<8x32xf32>
    %c4_164 = arith.constant 4 : index
    %c0_165 = arith.constant 0 : index
    %c0_166 = arith.constant 0 : index
    %245 = vector.load %arg12[%c4_164, %c0_165, %c0_166] : memref<16x32x1xf32, #tpu.memory_space<vmem>>, vector<1x32x1xf32>
    %246 = vector.shape_cast %245 : vector<1x32x1xf32> to vector<32x1xf32>
    %cst_167 = arith.constant dense<0.000000e+00> : vector<8x1xf32>
    %247 = tpu.matmul %244, %246, %cst_167 {dimension_numbers = #tpu.dot_dimension_numbers<[1], [0], [0], [1], [0, 0, 1, 1], [], []>} : vector<8x32xf32>, vector<32x1xf32>, vector<8x1xf32> -> vector<8x1xf32>
    %248 = arith.addf %243, %247 : vector<8x1xf32>
    %249 = vector.extract_strided_slice %224 {offsets = [40, 0], sizes = [8, 32], strides = [1, 1]} : vector<128x32xf32> to vector<8x32xf32>
    %c5_168 = arith.constant 5 : index
    %c0_169 = arith.constant 0 : index
    %c0_170 = arith.constant 0 : index
    %250 = vector.load %arg12[%c5_168, %c0_169, %c0_170] : memref<16x32x1xf32, #tpu.memory_space<vmem>>, vector<1x32x1xf32>
    %251 = vector.shape_cast %250 : vector<1x32x1xf32> to vector<32x1xf32>
    %cst_171 = arith.constant dense<0.000000e+00> : vector<8x1xf32>
    %252 = tpu.matmul %249, %251, %cst_171 {dimension_numbers = #tpu.dot_dimension_numbers<[1], [0], [0], [1], [0, 0, 1, 1], [], []>} : vector<8x32xf32>, vector<32x1xf32>, vector<8x1xf32> -> vector<8x1xf32>
    %253 = arith.addf %248, %252 : vector<8x1xf32>
    %254 = vector.extract_strided_slice %224 {offsets = [48, 0], sizes = [8, 32], strides = [1, 1]} : vector<128x32xf32> to vector<8x32xf32>
    %c6_172 = arith.constant 6 : index
    %c0_173 = arith.constant 0 : index
    %c0_174 = arith.constant 0 : index
    %255 = vector.load %arg12[%c6_172, %c0_173, %c0_174] : memref<16x32x1xf32, #tpu.memory_space<vmem>>, vector<1x32x1xf32>
    %256 = vector.shape_cast %255 : vector<1x32x1xf32> to vector<32x1xf32>
    %cst_175 = arith.constant dense<0.000000e+00> : vector<8x1xf32>
    %257 = tpu.matmul %254, %256, %cst_175 {dimension_numbers = #tpu.dot_dimension_numbers<[1], [0], [0], [1], [0, 0, 1, 1], [], []>} : vector<8x32xf32>, vector<32x1xf32>, vector<8x1xf32> -> vector<8x1xf32>
    %258 = arith.addf %253, %257 : vector<8x1xf32>
    %259 = vector.extract_strided_slice %224 {offsets = [56, 0], sizes = [8, 32], strides = [1, 1]} : vector<128x32xf32> to vector<8x32xf32>
    %c7_176 = arith.constant 7 : index
    %c0_177 = arith.constant 0 : index
    %c0_178 = arith.constant 0 : index
    %260 = vector.load %arg12[%c7_176, %c0_177, %c0_178] : memref<16x32x1xf32, #tpu.memory_space<vmem>>, vector<1x32x1xf32>
    %261 = vector.shape_cast %260 : vector<1x32x1xf32> to vector<32x1xf32>
    %cst_179 = arith.constant dense<0.000000e+00> : vector<8x1xf32>
    %262 = tpu.matmul %259, %261, %cst_179 {dimension_numbers = #tpu.dot_dimension_numbers<[1], [0], [0], [1], [0, 0, 1, 1], [], []>} : vector<8x32xf32>, vector<32x1xf32>, vector<8x1xf32> -> vector<8x1xf32>
    %263 = arith.addf %258, %262 : vector<8x1xf32>
    %264 = vector.extract_strided_slice %224 {offsets = [64, 0], sizes = [8, 32], strides = [1, 1]} : vector<128x32xf32> to vector<8x32xf32>
    %c8_180 = arith.constant 8 : index
    %c0_181 = arith.constant 0 : index
    %c0_182 = arith.constant 0 : index
    %265 = vector.load %arg12[%c8_180, %c0_181, %c0_182] : memref<16x32x1xf32, #tpu.memory_space<vmem>>, vector<1x32x1xf32>
    %266 = vector.shape_cast %265 : vector<1x32x1xf32> to vector<32x1xf32>
    %cst_183 = arith.constant dense<0.000000e+00> : vector<8x1xf32>
    %267 = tpu.matmul %264, %266, %cst_183 {dimension_numbers = #tpu.dot_dimension_numbers<[1], [0], [0], [1], [0, 0, 1, 1], [], []>} : vector<8x32xf32>, vector<32x1xf32>, vector<8x1xf32> -> vector<8x1xf32>
    %268 = arith.addf %263, %267 : vector<8x1xf32>
    %269 = vector.extract_strided_slice %224 {offsets = [72, 0], sizes = [8, 32], strides = [1, 1]} : vector<128x32xf32> to vector<8x32xf32>
    %c9_184 = arith.constant 9 : index
    %c0_185 = arith.constant 0 : index
    %c0_186 = arith.constant 0 : index
    %270 = vector.load %arg12[%c9_184, %c0_185, %c0_186] : memref<16x32x1xf32, #tpu.memory_space<vmem>>, vector<1x32x1xf32>
    %271 = vector.shape_cast %270 : vector<1x32x1xf32> to vector<32x1xf32>
    %cst_187 = arith.constant dense<0.000000e+00> : vector<8x1xf32>
    %272 = tpu.matmul %269, %271, %cst_187 {dimension_numbers = #tpu.dot_dimension_numbers<[1], [0], [0], [1], [0, 0, 1, 1], [], []>} : vector<8x32xf32>, vector<32x1xf32>, vector<8x1xf32> -> vector<8x1xf32>
    %273 = arith.addf %268, %272 : vector<8x1xf32>
    %274 = vector.extract_strided_slice %224 {offsets = [80, 0], sizes = [8, 32], strides = [1, 1]} : vector<128x32xf32> to vector<8x32xf32>
    %c10_188 = arith.constant 10 : index
    %c0_189 = arith.constant 0 : index
    %c0_190 = arith.constant 0 : index
    %275 = vector.load %arg12[%c10_188, %c0_189, %c0_190] : memref<16x32x1xf32, #tpu.memory_space<vmem>>, vector<1x32x1xf32>
    %276 = vector.shape_cast %275 : vector<1x32x1xf32> to vector<32x1xf32>
    %cst_191 = arith.constant dense<0.000000e+00> : vector<8x1xf32>
    %277 = tpu.matmul %274, %276, %cst_191 {dimension_numbers = #tpu.dot_dimension_numbers<[1], [0], [0], [1], [0, 0, 1, 1], [], []>} : vector<8x32xf32>, vector<32x1xf32>, vector<8x1xf32> -> vector<8x1xf32>
    %278 = arith.addf %273, %277 : vector<8x1xf32>
    %279 = vector.extract_strided_slice %224 {offsets = [88, 0], sizes = [8, 32], strides = [1, 1]} : vector<128x32xf32> to vector<8x32xf32>
    %c11_192 = arith.constant 11 : index
    %c0_193 = arith.constant 0 : index
    %c0_194 = arith.constant 0 : index
    %280 = vector.load %arg12[%c11_192, %c0_193, %c0_194] : memref<16x32x1xf32, #tpu.memory_space<vmem>>, vector<1x32x1xf32>
    %281 = vector.shape_cast %280 : vector<1x32x1xf32> to vector<32x1xf32>
    %cst_195 = arith.constant dense<0.000000e+00> : vector<8x1xf32>
    %282 = tpu.matmul %279, %281, %cst_195 {dimension_numbers = #tpu.dot_dimension_numbers<[1], [0], [0], [1], [0, 0, 1, 1], [], []>} : vector<8x32xf32>, vector<32x1xf32>, vector<8x1xf32> -> vector<8x1xf32>
    %283 = arith.addf %278, %282 : vector<8x1xf32>
    %284 = vector.extract_strided_slice %224 {offsets = [96, 0], sizes = [8, 32], strides = [1, 1]} : vector<128x32xf32> to vector<8x32xf32>
    %c12_196 = arith.constant 12 : index
    %c0_197 = arith.constant 0 : index
    %c0_198 = arith.constant 0 : index
    %285 = vector.load %arg12[%c12_196, %c0_197, %c0_198] : memref<16x32x1xf32, #tpu.memory_space<vmem>>, vector<1x32x1xf32>
    %286 = vector.shape_cast %285 : vector<1x32x1xf32> to vector<32x1xf32>
    %cst_199 = arith.constant dense<0.000000e+00> : vector<8x1xf32>
    %287 = tpu.matmul %284, %286, %cst_199 {dimension_numbers = #tpu.dot_dimension_numbers<[1], [0], [0], [1], [0, 0, 1, 1], [], []>} : vector<8x32xf32>, vector<32x1xf32>, vector<8x1xf32> -> vector<8x1xf32>
    %288 = arith.addf %283, %287 : vector<8x1xf32>
    %289 = vector.extract_strided_slice %224 {offsets = [104, 0], sizes = [8, 32], strides = [1, 1]} : vector<128x32xf32> to vector<8x32xf32>
    %c13_200 = arith.constant 13 : index
    %c0_201 = arith.constant 0 : index
    %c0_202 = arith.constant 0 : index
    %290 = vector.load %arg12[%c13_200, %c0_201, %c0_202] : memref<16x32x1xf32, #tpu.memory_space<vmem>>, vector<1x32x1xf32>
    %291 = vector.shape_cast %290 : vector<1x32x1xf32> to vector<32x1xf32>
    %cst_203 = arith.constant dense<0.000000e+00> : vector<8x1xf32>
    %292 = tpu.matmul %289, %291, %cst_203 {dimension_numbers = #tpu.dot_dimension_numbers<[1], [0], [0], [1], [0, 0, 1, 1], [], []>} : vector<8x32xf32>, vector<32x1xf32>, vector<8x1xf32> -> vector<8x1xf32>
    %293 = arith.addf %288, %292 : vector<8x1xf32>
    %294 = vector.extract_strided_slice %224 {offsets = [112, 0], sizes = [8, 32], strides = [1, 1]} : vector<128x32xf32> to vector<8x32xf32>
    %c14_204 = arith.constant 14 : index
    %c0_205 = arith.constant 0 : index
    %c0_206 = arith.constant 0 : index
    %295 = vector.load %arg12[%c14_204, %c0_205, %c0_206] : memref<16x32x1xf32, #tpu.memory_space<vmem>>, vector<1x32x1xf32>
    %296 = vector.shape_cast %295 : vector<1x32x1xf32> to vector<32x1xf32>
    %cst_207 = arith.constant dense<0.000000e+00> : vector<8x1xf32>
    %297 = tpu.matmul %294, %296, %cst_207 {dimension_numbers = #tpu.dot_dimension_numbers<[1], [0], [0], [1], [0, 0, 1, 1], [], []>} : vector<8x32xf32>, vector<32x1xf32>, vector<8x1xf32> -> vector<8x1xf32>
    %298 = arith.addf %293, %297 : vector<8x1xf32>
    %299 = vector.extract_strided_slice %224 {offsets = [120, 0], sizes = [8, 32], strides = [1, 1]} : vector<128x32xf32> to vector<8x32xf32>
    %c15_208 = arith.constant 15 : index
    %c0_209 = arith.constant 0 : index
    %c0_210 = arith.constant 0 : index
    %300 = vector.load %arg12[%c15_208, %c0_209, %c0_210] : memref<16x32x1xf32, #tpu.memory_space<vmem>>, vector<1x32x1xf32>
    %301 = vector.shape_cast %300 : vector<1x32x1xf32> to vector<32x1xf32>
    %cst_211 = arith.constant dense<0.000000e+00> : vector<8x1xf32>
    %302 = tpu.matmul %299, %301, %cst_211 {dimension_numbers = #tpu.dot_dimension_numbers<[1], [0], [0], [1], [0, 0, 1, 1], [], []>} : vector<8x32xf32>, vector<32x1xf32>, vector<8x1xf32> -> vector<8x1xf32>
    %303 = arith.addf %298, %302 : vector<8x1xf32>
    %304 = vector.extract_strided_slice %303 {offsets = [0, 0], sizes = [2, 1], strides = [1, 1]} : vector<8x1xf32> to vector<2x1xf32>
    %c0_212 = arith.constant 0 : index
    %c0_213 = arith.constant 0 : index
    %305 = vector.load %arg13[%c0_212, %c0_213] : memref<1x1xf32, #tpu.memory_space<vmem>>, vector<1x1xf32>
    %306 = vector.broadcast %305 : vector<1x1xf32> to vector<2x1xf32>
    %307 = arith.addf %304, %306 : vector<2x1xf32>
    %308 = arith.negf %307 : vector<2x1xf32>
    %309 = math.exp %308 : vector<2x1xf32>
    %cst_214 = arith.constant 1.000000e+00 : f32
    %310 = vector.broadcast %cst_214 : f32 to vector<2x1xf32>
    %311 = arith.addf %310, %309 : vector<2x1xf32>
    %312 = arith.divf %310, %311 : vector<2x1xf32>
    %c0_215 = arith.constant 0 : index
    %c0_216 = arith.constant 0 : index
    %313 = vector.load %arg14[%c0_215, %c0_216] : memref<2x1xf32, #tpu.memory_space<vmem>>, vector<2x1xf32>
    tpu.vector_store %arg14[%c0_215, %c0_216], %312 {strides = array<i32>} : memref<2x1xf32, #tpu.memory_space<vmem>>, vector<2x1xf32>,
    return
  }
}

</mosaic_0001>

<bundles_post_ra>
// kernel: discriminator_forward.1
= control target key start
LH: loop header
LB: loop body
LE: loop exit
PB: predicated region body
PF: predicated region fallthrough
CT: control target
= control target key end

     0   :  { %vm74_vm0 = vcmask 130048   ;;  %vm752_vm1 = vcmask 64512   ;;  %vm2477_vm2 = vcmask 261120   ;;  %vm6949_vm3 = vmmov 0   ;;  %s8054_s1 = inlined_call_operand.vmem [shape: f32[16,8], index: 1, kind: input, shape index: {}]   ;;  %s8055_s0 = inlined_call_operand.vmem [shape: f32[128,16], index: 0, kind: input, shape index: {}]   ;;  %s8056_s3 = inlined_call_operand.vmem [shape: f32[512,128], index: 3, kind: input, shape index: {}]   ;;  %s8057_s2 = inlined_call_operand.vmem [shape: f32[1,8], index: 2, kind: input, shape index: {}]   ;;  %s8058_s4 = inlined_call_operand.vmem [shape: f32[16,8,16], index: 4, kind: input, shape index: {}]   ;;  %s8059_s7 = inlined_call_operand.vmem [shape: f32[128,32], index: 7, kind: input, shape index: {}]   ;;  %s8060_s8 = inlined_call_operand.vmem [shape: f32[16,16,32], index: 8, kind: input, shape index: {}]   ;;  %s8061_s5 = inlined_call_operand.vmem [shape: f32[1,16], index: 5, kind: input, shape index: {}]   ;;  %s8062_s6 = inlined_call_operand.vmem [shape: f32[1,16], index: 6, kind: input, shape index: {}]   ;;  %s8063_s11 = inlined_call_operand.vmem [shape: f32[128,8], index: 11, kind: input, shape index: {}]   ;;  %s8064_s9 = inlined_call_operand.vmem [shape: f32[1,32], index: 9, kind: input, shape index: {}]   ;;  %s8065_s10 = inlined_call_operand.vmem [shape: f32[1,32], index: 10, kind: input, shape index: {}]   ;;  %s8066_s12 = inlined_call_operand.vmem [shape: f32[16,32,1], index: 12, kind: input, shape index: {}]   ;;  %s8067_s13 = inlined_call_operand.<no memory space> [shape: f32[1,1], index: 13, kind: input, shape index: {}]   ;;  %s8068_s14 = inlined_call_operand.vmem [shape: f32[2,1], index: 14, kind: output, shape index: {}]  }
   0x1   :  { %v65_v0 = vld [vmem:[%s8054_s1] sm:$0xff]  ;;  %v66_v1 = vld [vmem:[%s8054_s1 + $0x8] sm:$0xff]  ;;  %v51_v5 = vld [vmem:[%s8055_s0 + $0x10] sm:$0xff]  ;;  %vm5426_vm4 = vcmask 1024  }
   0x2   :  { %v49_v2 = vld [vmem:[%s8055_s0] sm:$0xff]  ;;  %v6657_v3 = vpack.c.bf16 %v66_v1, %v65_v0  ;;  %v50_v4 = vld [vmem:[%s8055_s0 + $0x8] sm:$0xff]  ;;  %v52_v6 = vld [vmem:[%s8055_s0 + $0x18] sm:$0xff] }
   0x3   :  { %6031 = vmatprep.mubr.msk.f32.mxu1 %vm74_vm0, %v49_v2  ;;  %v53_v7 = vld [vmem:[%s8055_s0 + $0x20] sm:$0xff]  ;;  %v54_v8 = vld [vmem:[%s8055_s0 + $0x28] sm:$0xff]  ;;  %v55_v9 = vld [vmem:[%s8055_s0 + $0x30] sm:$0xff] }
   0x4   :  { %6658 = vmatprep.subr.bf16.mxu1 %v6657_v3  ;;  %v56_v10 = vld [vmem:[%s8055_s0 + $0x38] sm:$0xff]  ;;  %v57_v11 = vld [vmem:[%s8055_s0 + $0x40] sm:$0xff]  ;;  %v58_v12 = vld [vmem:[%s8055_s0 + $0x48] sm:$0xff] }
   0x5   :  { %6660 = vmatpush3.bf16.msra.mxu1 %v6657_v3  ;;  %v59_v13 = vld [vmem:[%s8055_s0 + $0x50] sm:$0xff]  ;;  %v60_v14 = vld [vmem:[%s8055_s0 + $0x58] sm:$0xff]  ;;  %v61_v15 = vld [vmem:[%s8055_s0 + $0x60] sm:$0xff] }
   0x6   :  { %v62_v16 = vld [vmem:[%s8055_s0 + $0x68] sm:$0xff]  ;;  %v63_v17 = vld [vmem:[%s8055_s0 + $0x70] sm:$0xff]  ;;  %v64_v18 = vld [vmem:[%s8055_s0 + $0x78] sm:$0xff] }
   0x7   :  { %v300_v19 = vld [vmem:[%s8056_s3] sm:$0xff] }
   0x8   :  { %6032 = vmatmul.mubr.msk.f32.vlgmr.msra.gmra.mrb[0].mxu1 %vm74_vm0, %v50_v4  ;;  %v7102_v20 = vld [vmem:[%s8057_s2] ss:$0 sm:$0xff] }
   0x9   :  { %6034 = vmatprep.mubr.msk.f32.mxu1 %vm74_vm0, %v51_v5 }
   0xc   :  { %6035 = vmatmul.mubr.msk.f32.gmra.mrb[2].mxu1 %vm74_vm0, %v52_v6 }
   0xd   :  { %6037 = vmatprep.mubr.msk.f32.mxu1 %vm74_vm0, %v53_v7 }
  0x10   :  { %6038 = vmatmul.mubr.msk.f32.gmra.mrb[4].mxu1 %vm74_vm0, %v54_v8 }
  0x11   :  { %6040 = vmatprep.mubr.msk.f32.mxu1 %vm74_vm0, %v55_v9 }
  0x14   :  { %6041 = vmatmul.mubr.msk.f32.gmra.mrb[6].mxu1 %vm74_vm0, %v56_v10 }
  0x15   :  { %6043 = vmatprep.mubr.msk.f32.mxu1 %vm74_vm0, %v57_v11 }
  0x18   :  { %6044 = vmatmul.mubr.msk.f32.gmra.mrb[8].mxu1 %vm74_vm0, %v58_v12 }
  0x19   :  { %6046 = vmatprep.mubr.msk.f32.mxu1 %vm74_vm0, %v59_v13 }
  0x1c   :  { %6047 = vmatmul.mubr.msk.f32.gmra.mrb[10].mxu1 %vm74_vm0, %v60_v14 }
  0x1d   :  { %6049 = vmatprep.mubr.msk.f32.mxu1 %vm74_vm0, %v61_v15 }
  0x20   :  { %6050 = vmatmul.mubr.msk.f32.gmra.mrb[12].mxu1 %vm74_vm0, %v62_v16 }
  0x21   :  { %6052 = vmatprep.mubr.msk.f32.mxu1 %vm74_vm0, %v63_v17 }
  0x24   :  { %6053 = vmatmul.mubr.msk.f32.gmra.mrb[14].mxu1 %vm74_vm0, %v64_v18 }
  0x25   :  { %6087 = vmatprep.mubr.f32.mxu1 %v300_v19 }
  0xdb   :  { %v6033_v21 = vpop.f32.mrb[0].mxu1 }
  0xdc   :  { %v195_v22 = vadd.f32 %v6033_v21, %v7102_v20  ;;  %v189_v23 = vpop.f32.mrb[1].mxu1 }
  0xdd   :  { %v190_v24 = vadd.f32 %v7102_v20, %v189_v23 }
  0xde   :  { %v269_v25 = vmul.f32 0.1, %v195_v22 }
  0xdf   :  { %v268_v26 = vmul.f32 0.1, %v190_v24  ;;  %v6036_v27 = vpop.f32.mrb[2].mxu1 }
  0xe0   :  { %v285_v28 = vmax.f32 %v195_v22, %v269_v25  ;;  %v205_v29 = vadd.f32 %v6036_v27, %v7102_v20  ;;  %v199_v30 = vpop.f32.mrb[3].mxu1 }
  0xe1   :  { %v284_v31 = vmax.f32 %v190_v24, %v268_v26  ;;  %v200_v32 = vadd.f32 %v7102_v20, %v199_v30  ;;  %v301_v30 = vld [vmem:[%s8056_s3 + $0x8] sm:$0xff] }
  0xe2   :  { %v271_v33 = vmul.f32 0.1, %v205_v29 }
  0xe3   :  { %v270_v34 = vmul.f32 0.1, %v200_v32  ;;  %v6039_v35 = vpop.f32.mrb[4].mxu1  ;;  %v6661_v36 = vpack.c.bf16 %v285_v28, %v284_v31  ;;  %v303_v31 = vld [vmem:[%s8056_s3 + $0x18] sm:$0xff] }
  0xe4   :  { %v287_v37 = vmax.f32 %v205_v29, %v271_v33  ;;  %v215_v38 = vadd.f32 %v6039_v35, %v7102_v20  ;;  %v209_v39 = vpop.f32.mrb[5].mxu1  ;;  %v305_v33 = vld [vmem:[%s8056_s3 + $0x28] sm:$0xff]  ;;  %v307_v35 = vld [vmem:[%s8056_s3 + $0x38] sm:$0xff] }
  0xe5   :  { %v286_v40 = vmax.f32 %v200_v32, %v270_v34  ;;  %v210_v41 = vadd.f32 %v7102_v20, %v209_v39  ;;  %6662 = vmatprep.subr.bf16.mxu1 %v6661_v36  ;;  %v304_v32 = vld [vmem:[%s8056_s3 + $0x20] sm:$0xff]  ;;  %v306_v34 = vld [vmem:[%s8056_s3 + $0x30] sm:$0xff]  ;;  %v311_v39 = vld [vmem:[%s8056_s3 + $0x58] sm:$0xff] }
  0xe6   :  { %v273_v42 = vmul.f32 0.1, %v215_v38  ;;  %6664 = vmatpush3.bf16.msra.mxu1 %v6661_v36  ;;  %v308_v36 = vld [vmem:[%s8056_s3 + $0x40] sm:$0xff] }
  0xe7   :  { %v272_v43 = vmul.f32 0.1, %v210_v41  ;;  %v6042_v44 = vpop.f32.mrb[6].mxu1  ;;  %v6665_v45 = vpack.c.bf16 %v287_v37, %v286_v40  ;;  %v309_v37 = vld [vmem:[%s8056_s3 + $0x48] sm:$0xff]  ;;  %v312_v40 = vld [vmem:[%s8056_s3 + $0x60] sm:$0xff] }
  0xe8   :  { %v289_v46 = vmax.f32 %v215_v38, %v273_v42  ;;  %v225_v47 = vadd.f32 %v6042_v44, %v7102_v20  ;;  %v219_v48 = vpop.f32.mrb[7].mxu1  ;;  %v310_v38 = vld [vmem:[%s8056_s3 + $0x50] sm:$0xff]  ;;  %v316_v44 = vld [vmem:[%s8056_s3 + $0x80] sm:$0xff] }
  0xe9   :  { %v288_v49 = vmax.f32 %v210_v41, %v272_v43  ;;  %v220_v50 = vadd.f32 %v7102_v20, %v219_v48  ;;  %6666 = vmatprep.subr.bf16.mxu1 %v6665_v45  ;;  %v313_v41 = vld [vmem:[%s8056_s3 + $0x68] sm:$0xff]  ;;  %v314_v42 = vld [vmem:[%s8056_s3 + $0x70] sm:$0xff]  ;;  %v315_v43 = vld [vmem:[%s8056_s3 + $0x78] sm:$0xff] }
  0xea   :  { %v275_v51 = vmul.f32 0.1, %v225_v47  ;;  %6668 = vmatpush3.bf16.msra.mxu1 %v6665_v45  ;;  %v317_v45 = vld [vmem:[%s8056_s3 + $0x88] sm:$0xff]  ;;  %v320_v48 = vld [vmem:[%s8056_s3 + $0xa0] sm:$0xff] }
  0xeb   :  { %v274_v52 = vmul.f32 0.1, %v220_v50  ;;  %v6045_v53 = vpop.f32.mrb[8].mxu1  ;;  %v6669_v54 = vpack.c.bf16 %v289_v46, %v288_v49  ;;  %v318_v46 = vld [vmem:[%s8056_s3 + $0x90] sm:$0xff]  ;;  %v321_v49 = vld [vmem:[%s8056_s3 + $0xa8] sm:$0xff] }
  0xec   :  { %v291_v55 = vmax.f32 %v225_v47, %v275_v51  ;;  %v235_v56 = vadd.f32 %v6045_v53, %v7102_v20  ;;  %v229_v57 = vpop.f32.mrb[9].mxu1  ;;  %v319_v47 = vld [vmem:[%s8056_s3 + $0x98] sm:$0xff]  ;;  %v325_v53 = vld [vmem:[%s8056_s3 + $0xc8] sm:$0xff] }
  0xed   :  { %v290_v58 = vmax.f32 %v220_v50, %v274_v52  ;;  %v230_v59 = vadd.f32 %v7102_v20, %v229_v57  ;;  %6670 = vmatprep.subr.bf16.mxu1 %v6669_v54  ;;  %v322_v50 = vld [vmem:[%s8056_s3 + $0xb0] sm:$0xff]  ;;  %v323_v51 = vld [vmem:[%s8056_s3 + $0xb8] sm:$0xff]  ;;  %v324_v52 = vld [vmem:[%s8056_s3 + $0xc0] sm:$0xff] }
  0xee   :  { %v277_v60 = vmul.f32 0.1, %v235_v56  ;;  %6672 = vmatpush3.bf16.msra.mxu1 %v6669_v54  ;;  %v326_v54 = vld [vmem:[%s8056_s3 + $0xd0] sm:$0xff]  ;;  %v329_v57 = vld [vmem:[%s8056_s3 + $0xe8] sm:$0xff] }
  0xef   :  { %v276_v61 = vmul.f32 0.1, %v230_v59  ;;  %v6048_v62 = vpop.f32.mrb[10].mxu1  ;;  %v6673_v63 = vpack.c.bf16 %v291_v55, %v290_v58  ;;  %v327_v55 = vld [vmem:[%s8056_s3 + $0xd8] sm:$0xff]  ;;  %v330_v58 = vld [vmem:[%s8056_s3 + $0xf0] sm:$0xff] }
  0xf0   :  { %v293_v0 = vmax.f32 %v235_v56, %v277_v60  ;;  %v245_v1 = vadd.f32 %v6048_v62, %v7102_v20  ;;  %v239_v2 = vpop.f32.mrb[11].mxu1  ;;  %v328_v56 = vld [vmem:[%s8056_s3 + $0xe0] sm:$0xff]  ;;  %v334_v62 = vld [vmem:[%s8056_s3 + $0x110] sm:$0xff] }
  0xf1   :  { %v292_v3 = vmax.f32 %v230_v59, %v276_v61  ;;  %v240_v4 = vadd.f32 %v7102_v20, %v239_v2  ;;  %6674 = vmatprep.subr.bf16.mxu1 %v6673_v63  ;;  %v331_v59 = vld [vmem:[%s8056_s3 + $0xf8] sm:$0xff]  ;;  %v332_v60 = vld [vmem:[%s8056_s3 + $0x100] sm:$0xff]  ;;  %v333_v61 = vld [vmem:[%s8056_s3 + $0x108] sm:$0xff] }
  0xf2   :  { %v279_v5 = vmul.f32 0.1, %v245_v1  ;;  %6676 = vmatpush3.bf16.msra.mxu1 %v6673_v63  ;;  %v335_v63 = vld [vmem:[%s8056_s3 + $0x118] sm:$0xff]  ;;  %v338_v2 = vld [vmem:[%s8056_s3 + $0x130] sm:$0xff] }
  0xf3   :  { %v278_v6 = vmul.f32 0.1, %v240_v4  ;;  %v6051_v7 = vpop.f32.mrb[12].mxu1  ;;  %v6677_v8 = vpack.c.bf16 %v293_v0, %v292_v3  ;;  %v336_v0 = vld [vmem:[%s8056_s3 + $0x120] sm:$0xff]  ;;  %v339_v3 = vld [vmem:[%s8056_s3 + $0x138] sm:$0xff] }
  0xf4   :  { %v295_v9 = vmax.f32 %v245_v1, %v279_v5  ;;  %v255_v10 = vadd.f32 %v6051_v7, %v7102_v20  ;;  %v249_v11 = vpop.f32.mrb[13].mxu1  ;;  %v337_v1 = vld [vmem:[%s8056_s3 + $0x128] sm:$0xff]  ;;  %v343_v7 = vld [vmem:[%s8056_s3 + $0x158] sm:$0xff] }
  0xf5   :  { %v294_v12 = vmax.f32 %v240_v4, %v278_v6  ;;  %v250_v13 = vadd.f32 %v7102_v20, %v249_v11  ;;  %6678 = vmatprep.subr.bf16.mxu1 %v6677_v8  ;;  %v340_v4 = vld [vmem:[%s8056_s3 + $0x140] sm:$0xff]  ;;  %v341_v5 = vld [vmem:[%s8056_s3 + $0x148] sm:$0xff]  ;;  %v342_v6 = vld [vmem:[%s8056_s3 + $0x150] sm:$0xff] }
  0xf6   :  { %v281_v14 = vmul.f32 0.1, %v255_v10  ;;  %6680 = vmatpush3.bf16.msra.mxu1 %v6677_v8  ;;  %v344_v8 = vld [vmem:[%s8056_s3 + $0x160] sm:$0xff]  ;;  %v347_v11 = vld [vmem:[%s8056_s3 + $0x178] sm:$0xff] }
  0xf7   :  { %v280_v15 = vmul.f32 0.1, %v250_v13  ;;  %v6054_v16 = vpop.f32.mrb[14].mxu1  ;;  %v6681_v17 = vpack.c.bf16 %v295_v9, %v294_v12  ;;  %v345_v9 = vld [vmem:[%s8056_s3 + $0x168] sm:$0xff]  ;;  %v348_v12 = vld [vmem:[%s8056_s3 + $0x180] sm:$0xff] }
  0xf8   :  { %v297_v18 = vmax.f32 %v255_v10, %v281_v14  ;;  %v265_v19 = vadd.f32 %v6054_v16, %v7102_v20  ;;  %v259_v21 = vpop.f32.mrb[15].mxu1  ;;  %v346_v10 = vld [vmem:[%s8056_s3 + $0x170] sm:$0xff]  ;;  %v349_v14 = vld [vmem:[%s8056_s3 + $0x188] sm:$0xff]  ;;  %v351_v16 = vld [vmem:[%s8056_s3 + $0x198] sm:$0xff] }
  0xf9   :  { %v296_v22 = vmax.f32 %v250_v13, %v280_v15  ;;  %v260_v23 = vadd.f32 %v7102_v20, %v259_v21  ;;  %6682 = vmatprep.subr.bf16.mxu1 %v6681_v17  ;;  %v302_v20 = vld [vmem:[%s8056_s3 + $0x10] sm:$0xff]  ;;  %v5449_v13 = vld [vmem:[%s8058_s4 + $0x8] sm:$0xff] }
  0xfa   :  { %v283_v24 = vmul.f32 0.1, %v265_v19  ;;  %6684 = vmatpush3.bf16.msra.mxu1 %v6681_v17  ;;  %6183 = vmatprep.subr.mxu0 %v5449_v13  ;;  %v350_v15 = vld [vmem:[%s8056_s3 + $0x190] sm:$0xff]  ;;  %v352_v17 = vld [vmem:[%s8056_s3 + $0x1a0] sm:$0xff] }
  0xfb   :  { %v282_v25 = vmul.f32 0.1, %v260_v23  ;;  %v6685_v26 = vpack.c.bf16 %v297_v18, %v296_v22  ;;  %6184 = vmatpush3.msra.mxu0 %v5449_v13  ;;  %v749_v18 = vld [vmem:[%s8058_s4] sm:$0xff]  ;;  %v354_v21 = vld [vmem:[%s8056_s3 + $0x1b0] sm:$0xff]  ;;  %v355_v22 = vld [vmem:[%s8056_s3 + $0x1b8] sm:$0xff] }
  0xfc   :  { %v299_v27 = vmax.f32 %v265_v19, %v283_v24  ;;  %6191 = vmatprep.subr.mxu0 %v749_v18  ;;  %v353_v19 = vld [vmem:[%s8056_s3 + $0x1a8] sm:$0xff] }
  0xfd   :  { %v298_v28 = vmax.f32 %v260_v23, %v282_v25  ;;  %6686 = vmatprep.subr.bf16.mxu1 %v6685_v26  ;;  %v356_v23 = vld [vmem:[%s8056_s3 + $0x1c0] sm:$0xff]  ;;  %v357_v24 = vld [vmem:[%s8056_s3 + $0x1c8] sm:$0xff]  ;;  %v358_v25 = vld [vmem:[%s8056_s3 + $0x1d0] sm:$0xff] }
  0xfe   :  { %6688 = vmatpush3.bf16.msra.mxu1 %v6685_v26  ;;  %v359_v26 = vld [vmem:[%s8056_s3 + $0x1d8] sm:$0xff] }
  0xff   :  { %v6689_v29 = vpack.c.bf16 %v299_v27, %v298_v28  ;;  %v360_v27 = vld [vmem:[%s8056_s3 + $0x1e0] sm:$0xff]  ;;  %v361_v28 = vld [vmem:[%s8056_s3 + $0x1e8] sm:$0xff] }
 0x101   :  { %6690 = vmatprep.subr.bf16.mxu1 %v6689_v29 }
 0x102   :  { %6692 = vmatpush3.bf16.msra.mxu1 %v6689_v29  ;;  %v362_v29 = vld [vmem:[%s8056_s3 + $0x1f0] sm:$0xff] }
 0x105   :  { %6088 = vmatmul.mubr.f32.vlgmr.msra.gmra.mrb[16].mxu1 %v301_v30  ;;  %v363_v30 = vld [vmem:[%s8056_s3 + $0x1f8] sm:$0xff] }
 0x106   :  { %6090 = vmatprep.mubr.f32.mxu1 %v302_v20 }
 0x109   :  { %6091 = vmatmul.mubr.f32.gmra.mrb[18].mxu1 %v303_v31 }
 0x10a   :  { %6093 = vmatprep.mubr.f32.mxu1 %v304_v32 }
 0x10d   :  { %6094 = vmatmul.mubr.f32.gmra.mrb[20].mxu1 %v305_v33 }
 0x10e   :  { %6096 = vmatprep.mubr.f32.mxu1 %v306_v34 }
 0x111   :  { %6097 = vmatmul.mubr.f32.gmra.mrb[22].mxu1 %v307_v35 }
 0x112   :  { %6099 = vmatprep.mubr.f32.mxu1 %v308_v36  ;;  %v5458_v36 = vld [vmem:[%s8058_s4 + $0x10] sm:$0xff] }
 0x115   :  { %6100 = vmatmul.mubr.f32.gmra.mrb[24].mxu1 %v309_v37 }
 0x116   :  { %6102 = vmatprep.mubr.f32.mxu1 %v310_v38 }
 0x119   :  { %6103 = vmatmul.mubr.f32.gmra.mrb[26].mxu1 %v311_v39 }
 0x11a   :  { %6105 = vmatprep.mubr.f32.mxu1 %v312_v40 }
 0x11d   :  { %6106 = vmatmul.mubr.f32.gmra.mrb[28].mxu1 %v313_v41  ;;  %v5463_v41 = vld [vmem:[%s8058_s4 + $0x18] sm:$0xff] }
 0x11e   :  { %6108 = vmatprep.mubr.f32.mxu1 %v314_v42 }
 0x121   :  { %6109 = vmatmul.mubr.f32.gmra.mrb[30].mxu1 %v315_v43 }
 0x122   :  { %6111 = vmatprep.mubr.f32.mxu1 %v316_v44 }
 0x125   :  { %6112 = vmatmul.mubr.f32.gmra.mrb[32].mxu1 %v317_v45 }
 0x126   :  { %6114 = vmatprep.mubr.f32.mxu1 %v318_v46  ;;  %v5468_v46 = vld [vmem:[%s8058_s4 + $0x20] sm:$0xff] }
 0x129   :  { %6115 = vmatmul.mubr.f32.gmra.mrb[34].mxu1 %v319_v47 }
 0x12a   :  { %6117 = vmatprep.mubr.f32.mxu1 %v320_v48 }
 0x12d   :  { %6118 = vmatmul.mubr.f32.gmra.mrb[36].mxu1 %v321_v49 }
 0x12e   :  { %6120 = vmatprep.mubr.f32.mxu1 %v322_v50 }
 0x131   :  { %6121 = vmatmul.mubr.f32.gmra.mrb[38].mxu1 %v323_v51  ;;  %v5473_v51 = vld [vmem:[%s8058_s4 + $0x28] sm:$0xff] }
 0x132   :  { %6123 = vmatprep.mubr.f32.mxu1 %v324_v52 }
 0x135   :  { %6124 = vmatmul.mubr.f32.gmra.mrb[40].mxu1 %v325_v53 }
 0x136   :  { %6126 = vmatprep.mubr.f32.mxu1 %v326_v54 }
 0x139   :  { %6127 = vmatmul.mubr.f32.gmra.mrb[42].mxu1 %v327_v55 }
 0x13a   :  { %6129 = vmatprep.mubr.f32.mxu1 %v328_v56  ;;  %v5478_v56 = vld [vmem:[%s8058_s4 + $0x30] sm:$0xff] }
 0x13d   :  { %6130 = vmatmul.mubr.f32.gmra.mrb[44].mxu1 %v329_v57 }
 0x13e   :  { %6132 = vmatprep.mubr.f32.mxu1 %v330_v58 }
 0x141   :  { %6133 = vmatmul.mubr.f32.gmra.mrb[46].mxu1 %v331_v59 }
 0x142   :  { %6135 = vmatprep.mubr.f32.mxu1 %v332_v60 }
 0x145   :  { %6136 = vmatmul.mubr.f32.gmra.mrb[48].mxu1 %v333_v61  ;;  %v5483_v61 = vld [vmem:[%s8058_s4 + $0x38] sm:$0xff] }
 0x146   :  { %6138 = vmatprep.mubr.f32.mxu1 %v334_v62 }
 0x149   :  { %6139 = vmatmul.mubr.f32.gmra.mrb[50].mxu1 %v335_v63 }
 0x14a   :  { %6141 = vmatprep.mubr.f32.mxu1 %v336_v0 }
 0x14d   :  { %6142 = vmatmul.mubr.f32.gmra.mrb[52].mxu1 %v337_v1 }
 0x14e   :  { %6144 = vmatprep.mubr.f32.mxu1 %v338_v2  ;;  %v5488_v2 = vld [vmem:[%s8058_s4 + $0x40] sm:$0xff] }
 0x151   :  { %6145 = vmatmul.mubr.f32.gmra.mrb[54].mxu1 %v339_v3 }
 0x152   :  { %6147 = vmatprep.mubr.f32.mxu1 %v340_v4 }
 0x155   :  { %6148 = vmatmul.mubr.f32.gmra.mrb[56].mxu1 %v341_v5 }
 0x156   :  { %6150 = vmatprep.mubr.f32.mxu1 %v342_v6 }
 0x159   :  { %6151 = vmatmul.mubr.f32.gmra.mrb[58].mxu1 %v343_v7  ;;  %v5493_v7 = vld [vmem:[%s8058_s4 + $0x48] sm:$0xff] }
 0x15a   :  { %6153 = vmatprep.mubr.f32.mxu1 %v344_v8 }
 0x15d   :  { %6154 = vmatmul.mubr.f32.gmra.mrb[60].mxu1 %v345_v9 }
 0x15e   :  { %6156 = vmatprep.mubr.f32.mxu1 %v346_v10 }
 0x161   :  { %6157 = vmatmul.mubr.f32.gmra.mrb[62].mxu1 %v347_v11 }
 0x162   :  { %6159 = vmatprep.mubr.f32.mxu1 %v348_v12  ;;  %v5498_v12 = vld [vmem:[%s8058_s4 + $0x50] sm:$0xff] }
 0x165   :  { %6160 = vmatmul.mubr.f32.gmra.mrb[64].mxu1 %v349_v14 }
 0x166   :  { %6162 = vmatprep.mubr.f32.mxu1 %v350_v15 }
 0x169   :  { %6163 = vmatmul.mubr.f32.gmra.mrb[66].mxu1 %v351_v16 }
 0x16a   :  { %6165 = vmatprep.mubr.f32.mxu1 %v352_v17  ;;  %v5503_v17 = vld [vmem:[%s8058_s4 + $0x58] sm:$0xff] }
 0x16d   :  { %6166 = vmatmul.mubr.f32.gmra.mrb[68].mxu1 %v353_v19 }
 0x16e   :  { %6168 = vmatprep.mubr.f32.mxu1 %v354_v21 }
 0x171   :  { %6169 = vmatmul.mubr.f32.gmra.mrb[70].mxu1 %v355_v22 }
 0x172   :  { %6171 = vmatprep.mubr.f32.mxu1 %v356_v23  ;;  %v5508_v23 = vld [vmem:[%s8058_s4 + $0x60] sm:$0xff] }
 0x175   :  { %6172 = vmatmul.mubr.f32.gmra.mrb[72].mxu1 %v357_v24 }
 0x176   :  { %6174 = vmatprep.mubr.f32.mxu1 %v358_v25 }
 0x179   :  { %6175 = vmatmul.mubr.f32.gmra.mrb[74].mxu1 %v359_v26 }
 0x17a   :  { %6177 = vmatprep.mubr.f32.mxu1 %v360_v27 }
 0x17d   :  { %6178 = vmatmul.mubr.f32.gmra.mrb[76].mxu1 %v361_v28  ;;  %v5513_v28 = vld [vmem:[%s8058_s4 + $0x68] sm:$0xff] }
 0x17e   :  { %6180 = vmatprep.mubr.f32.mxu1 %v362_v29 }
 0x181   :  { %6181 = vmatmul.mubr.f32.gmra.mrb[78].mxu1 %v363_v30 }
 0x1d8   :  { %v6089_v20 = vpop.f32.mrb[16].mxu1 }
 0x1d9   :  { %v430_v31 = vpop.f32.mrb[17].mxu1 }
 0x1dc   :  { %v6092_v32 = vpop.f32.mrb[18].mxu1 }
 0x1dd   :  { %v440_v33 = vpop.f32.mrb[19].mxu1 }
 0x1e0   :  { %v6095_v34 = vpop.f32.mrb[20].mxu1 }
 0x1e1   :  { %v450_v35 = vpop.f32.mrb[21].mxu1 }
 0x1e2   :  { %6185 = vmatprep.mubr.msk.f32.mxu0 %vm752_vm1, %v450_v35 }
 0x1e3   :  { %6186 = vmatmul.mubr.msk.f32.vlgmr.msra.gmra.mrb[0].mxu0 %vm752_vm1, %v6095_v34 }
 0x1e4   :  { %v6098_v37 = vpop.f32.mrb[22].mxu1  ;;  %6192 = vmatpush3.msra.mxu0 %v749_v18 }
 0x1e5   :  { %v460_v38 = vpop.f32.mrb[23].mxu1  ;;  %6199 = vmatprep.subr.mxu0 %v5458_v36 }
 0x1e6   :  { %6188 = vmatprep.mubr.msk.f32.mxu0 %vm752_vm1, %v460_v38 }
 0x1e7   :  { %6189 = vmatmul.mubr.msk.f32.gmra.mrb[2].mxu0 %vm752_vm1, %v6098_v37  ;;  %v5523_v37 = vld [vmem:[%s8058_s4 + $0x78] sm:$0xff] }
 0x1e8   :  { %6193 = vmatprep.mubr.msk.f32.mxu0 %vm752_vm1, %v430_v31  ;;  %v6101_v39 = vpop.f32.mrb[24].mxu1 }
 0x1e9   :  { %v470_v40 = vpop.f32.mrb[25].mxu1 }
 0x1eb   :  { %6194 = vmatmul.mubr.msk.f32.vlgmr.msra.gmra.mrb[0].mxu0 %vm752_vm1, %v6089_v20 }
 0x1ec   :  { %6196 = vmatprep.mubr.msk.f32.mxu0 %vm752_vm1, %v440_v33  ;;  %6200 = vmatpush3.msra.mxu0 %v5458_v36  ;;  %v6104_v42 = vpop.f32.mrb[26].mxu1 }
 0x1ed   :  { %v480_v43 = vpop.f32.mrb[27].mxu1  ;;  %6207 = vmatprep.subr.mxu0 %v5463_v41 }
 0x1ef   :  { %6197 = vmatmul.mubr.msk.f32.gmra.mrb[2].mxu0 %vm752_vm1, %v6092_v32  ;;  %v5518_v32 = vld [vmem:[%s8058_s4 + $0x70] sm:$0xff] }
 0x1f0   :  { %6201 = vmatprep.mubr.msk.f32.mxu0 %vm752_vm1, %v470_v40  ;;  %v6107_v44 = vpop.f32.mrb[28].mxu1 }
 0x1f1   :  { %v490_v45 = vpop.f32.mrb[29].mxu1 }
 0x1f3   :  { %6202 = vmatmul.mubr.msk.f32.vlgmr.msra.gmra.mrb[0].mxu0 %vm752_vm1, %v6101_v39 }
 0x1f4   :  { %6204 = vmatprep.mubr.msk.f32.mxu0 %vm752_vm1, %v480_v43  ;;  %6208 = vmatpush3.msra.mxu0 %v5463_v41  ;;  %v6110_v47 = vpop.f32.mrb[30].mxu1 }
 0x1f5   :  { %v500_v48 = vpop.f32.mrb[31].mxu1  ;;  %6215 = vmatprep.subr.mxu0 %v5468_v46 }
 0x1f7   :  { %6205 = vmatmul.mubr.msk.f32.gmra.mrb[2].mxu0 %vm752_vm1, %v6104_v42 }
 0x1f8   :  { %6209 = vmatprep.mubr.msk.f32.mxu0 %vm752_vm1, %v490_v45  ;;  %v6113_v49 = vpop.f32.mrb[32].mxu1  ;;  %v6948_v45 = vmov 0.0|0.0  }
 0x1f9   :  { %v510_v50 = vpop.f32.mrb[33].mxu1 }
 0x1fb   :  { %6210 = vmatmul.mubr.msk.f32.vlgmr.msra.gmra.mrb[0].mxu0 %vm752_vm1, %v6107_v44  ;;  %v2461_v44 = vld [vmem:[%s8059_s7] sm:$0xff] }
 0x1fc   :  { %6212 = vmatprep.mubr.msk.f32.mxu0 %vm752_vm1, %v500_v48  ;;  %6216 = vmatpush3.msra.mxu0 %v5468_v46  ;;  %v6116_v52 = vpop.f32.mrb[34].mxu1  ;;  %v5544_v46 = vld [vmem:[%s8060_s8 + $0x10] sm:$0xff] }
 0x1fd   :  { %v520_v53 = vpop.f32.mrb[35].mxu1  ;;  %6223 = vmatprep.subr.mxu0 %v5473_v51  ;;  %6319 = vmatprep.mubr.msk.f32.mxu1 %vm2477_vm2, %v2461_v44 }
 0x1ff   :  { %6213 = vmatmul.mubr.msk.f32.gmra.mrb[2].mxu0 %vm752_vm1, %v6110_v47  ;;  %v5545_v47 = vld [vmem:[%s8060_s8 + $0x18] sm:$0xff] }
 0x200   :  { %6217 = vmatprep.mubr.msk.f32.mxu0 %vm752_vm1, %v510_v50  ;;  %v6119_v54 = vpop.f32.mrb[36].mxu1  ;;  %v6702_v48 = vpack.c.bf16 %v5545_v47, %v5544_v46 }
 0x201   :  { %v530_v55 = vpop.f32.mrb[37].mxu1 }
 0x203   :  { %6218 = vmatmul.mubr.msk.f32.vlgmr.msra.gmra.mrb[0].mxu0 %vm752_vm1, %v6113_v49 }
 0x204   :  { %6220 = vmatprep.mubr.msk.f32.mxu0 %vm752_vm1, %v520_v53  ;;  %6224 = vmatpush3.msra.mxu0 %v5473_v51  ;;  %v6122_v57 = vpop.f32.mrb[38].mxu1 }
 0x205   :  { %v540_v58 = vpop.f32.mrb[39].mxu1  ;;  %6231 = vmatprep.subr.mxu0 %v5478_v56 }
 0x207   :  { %6221 = vmatmul.mubr.msk.f32.gmra.mrb[2].mxu0 %vm752_vm1, %v6116_v52 }
 0x208   :  { %6225 = vmatprep.mubr.msk.f32.mxu0 %vm752_vm1, %v530_v55  ;;  %v6125_v59 = vpop.f32.mrb[40].mxu1 }
 0x209   :  { %v550_v60 = vpop.f32.mrb[41].mxu1 }
 0x20b   :  { %6226 = vmatmul.mubr.msk.f32.vlgmr.msra.gmra.mrb[0].mxu0 %vm752_vm1, %v6119_v54 }
 0x20c   :  { %6228 = vmatprep.mubr.msk.f32.mxu0 %vm752_vm1, %v540_v58  ;;  %6232 = vmatpush3.msra.mxu0 %v5478_v56  ;;  %v6128_v62 = vpop.f32.mrb[42].mxu1 }
 0x20d   :  { %v560_v63 = vpop.f32.mrb[43].mxu1  ;;  %6239 = vmatprep.subr.mxu0 %v5483_v61 }
 0x20f   :  { %6229 = vmatmul.mubr.msk.f32.gmra.mrb[2].mxu0 %vm752_vm1, %v6122_v57 }
 0x210   :  { %6233 = vmatprep.mubr.msk.f32.mxu0 %vm752_vm1, %v550_v60  ;;  %v6131_v0 = vpop.f32.mrb[44].mxu1 }
 0x211   :  { %v570_v1 = vpop.f32.mrb[45].mxu1 }
 0x213   :  { %6234 = vmatmul.mubr.msk.f32.vlgmr.msra.gmra.mrb[0].mxu0 %vm752_vm1, %v6125_v59 }
 0x214   :  { %6236 = vmatprep.mubr.msk.f32.mxu0 %vm752_vm1, %v560_v63  ;;  %6240 = vmatpush3.msra.mxu0 %v5483_v61  ;;  %v6134_v3 = vpop.f32.mrb[46].mxu1 }
 0x215   :  { %v580_v4 = vpop.f32.mrb[47].mxu1  ;;  %6247 = vmatprep.subr.mxu0 %v5488_v2 }
 0x217   :  { %6237 = vmatmul.mubr.msk.f32.gmra.mrb[2].mxu0 %vm752_vm1, %v6128_v62 }
 0x218   :  { %6241 = vmatprep.mubr.msk.f32.mxu0 %vm752_vm1, %v570_v1  ;;  %v6137_v5 = vpop.f32.mrb[48].mxu1 }
 0x219   :  { %v590_v6 = vpop.f32.mrb[49].mxu1 }
 0x21b   :  { %6242 = vmatmul.mubr.msk.f32.vlgmr.msra.gmra.mrb[0].mxu0 %vm752_vm1, %v6131_v0 }
 0x21c   :  { %6244 = vmatprep.mubr.msk.f32.mxu0 %vm752_vm1, %v580_v4  ;;  %6248 = vmatpush3.msra.mxu0 %v5488_v2  ;;  %v6140_v8 = vpop.f32.mrb[50].mxu1 }
 0x21d   :  { %v600_v9 = vpop.f32.mrb[51].mxu1  ;;  %6255 = vmatprep.subr.mxu0 %v5493_v7 }
 0x21f   :  { %6245 = vmatmul.mubr.msk.f32.gmra.mrb[2].mxu0 %vm752_vm1, %v6134_v3 }
 0x220   :  { %6249 = vmatprep.mubr.msk.f32.mxu0 %vm752_vm1, %v590_v6  ;;  %v6143_v10 = vpop.f32.mrb[52].mxu1 }
 0x221   :  { %v610_v11 = vpop.f32.mrb[53].mxu1 }
 0x223   :  { %6250 = vmatmul.mubr.msk.f32.vlgmr.msra.gmra.mrb[0].mxu0 %vm752_vm1, %v6137_v5 }
 0x224   :  { %6252 = vmatprep.mubr.msk.f32.mxu0 %vm752_vm1, %v600_v9  ;;  %6256 = vmatpush3.msra.mxu0 %v5493_v7  ;;  %v6146_v13 = vpop.f32.mrb[54].mxu1 }
 0x225   :  { %v620_v14 = vpop.f32.mrb[55].mxu1  ;;  %6263 = vmatprep.subr.mxu0 %v5498_v12 }
 0x227   :  { %6253 = vmatmul.mubr.msk.f32.gmra.mrb[2].mxu0 %vm752_vm1, %v6140_v8 }
 0x228   :  { %6257 = vmatprep.mubr.msk.f32.mxu0 %vm752_vm1, %v610_v11  ;;  %v6149_v15 = vpop.f32.mrb[56].mxu1 }
 0x229   :  { %v630_v16 = vpop.f32.mrb[57].mxu1 }
 0x22b   :  { %6258 = vmatmul.mubr.msk.f32.vlgmr.msra.gmra.mrb[0].mxu0 %vm752_vm1, %v6143_v10 }
 0x22c   :  { %6260 = vmatprep.mubr.msk.f32.mxu0 %vm752_vm1, %v620_v14  ;;  %6264 = vmatpush3.msra.mxu0 %v5498_v12  ;;  %v6152_v18 = vpop.f32.mrb[58].mxu1 }
 0x22d   :  { %v640_v19 = vpop.f32.mrb[59].mxu1  ;;  %6271 = vmatprep.subr.mxu0 %v5503_v17 }
 0x22f   :  { %6261 = vmatmul.mubr.msk.f32.gmra.mrb[2].mxu0 %vm752_vm1, %v6146_v13 }
 0x230   :  { %6265 = vmatprep.mubr.msk.f32.mxu0 %vm752_vm1, %v630_v16  ;;  %v6155_v21 = vpop.f32.mrb[60].mxu1 }
 0x231   :  { %v650_v22 = vpop.f32.mrb[61].mxu1 }
 0x233   :  { %6266 = vmatmul.mubr.msk.f32.vlgmr.msra.gmra.mrb[0].mxu0 %vm752_vm1, %v6149_v15 }
 0x234   :  { %6268 = vmatprep.mubr.msk.f32.mxu0 %vm752_vm1, %v640_v19  ;;  %6272 = vmatpush3.msra.mxu0 %v5503_v17  ;;  %v6158_v24 = vpop.f32.mrb[62].mxu1 }
 0x235   :  { %v660_v25 = vpop.f32.mrb[63].mxu1  ;;  %6279 = vmatprep.subr.mxu0 %v5508_v23 }
 0x237   :  { %6269 = vmatmul.mubr.msk.f32.gmra.mrb[2].mxu0 %vm752_vm1, %v6152_v18 }
 0x238   :  { %6273 = vmatprep.mubr.msk.f32.mxu0 %vm752_vm1, %v650_v22  ;;  %v6161_v26 = vpop.f32.mrb[64].mxu1 }
 0x239   :  { %v670_v27 = vpop.f32.mrb[65].mxu1 }
 0x23b   :  { %6274 = vmatmul.mubr.msk.f32.vlgmr.msra.gmra.mrb[0].mxu0 %vm752_vm1, %v6155_v21 }
 0x23c   :  { %6276 = vmatprep.mubr.msk.f32.mxu0 %vm752_vm1, %v660_v25  ;;  %6280 = vmatpush3.msra.mxu0 %v5508_v23  ;;  %v6164_v29 = vpop.f32.mrb[66].mxu1 }
 0x23d   :  { %v680_v30 = vpop.f32.mrb[67].mxu1  ;;  %6287 = vmatprep.subr.mxu0 %v5513_v28 }
 0x23f   :  { %6277 = vmatmul.mubr.msk.f32.gmra.mrb[2].mxu0 %vm752_vm1, %v6158_v24 }
 0x240   :  { %6281 = vmatprep.mubr.msk.f32.mxu0 %vm752_vm1, %v670_v27  ;;  %v6167_v20 = vpop.f32.mrb[68].mxu1  ;;  %v2434_v27 = vlaneseq }
 0x241   :  { %v690_v31 = vpop.f32.mrb[69].mxu1 }
 0x243   :  { %6282 = vmatmul.mubr.msk.f32.vlgmr.msra.gmra.mrb[0].mxu0 %vm752_vm1, %v6161_v26 }
 0x244   :  { %6284 = vmatprep.mubr.msk.f32.mxu0 %vm752_vm1, %v680_v30  ;;  %6288 = vmatpush3.msra.mxu0 %v5513_v28  ;;  %v6170_v33 = vpop.f32.mrb[70].mxu1  ;;  %v2435_v28 = vshrl.u32 %v2434_v27, 7 }
 0x245   :  { %v700_v34 = vpop.f32.mrb[71].mxu1  ;;  %6295 = vmatprep.subr.mxu0 %v5518_v32 }
 0x246   :  { %v7444_v30 = vsub.s32 0, %v2435_v28  ;;  %v5554_v28 = vld [vmem:[%s8060_s8 + $0x40] sm:$0xff] }
 0x247   :  { %6285 = vmatmul.mubr.msk.f32.gmra.mrb[2].mxu0 %vm752_vm1, %v6164_v29  ;;  %v2426_v29 = vld [vmem:[%s8061_s5] sm:$0x1] }
 0x248   :  { %6289 = vmatprep.mubr.msk.f32.mxu0 %vm752_vm1, %v690_v31  ;;  %v6173_v35 = vpop.f32.mrb[72].mxu1 }
 0x249   :  { %v710_v36 = vpop.f32.mrb[73].mxu1 }
 0x24b   :  { %6290 = vmatmul.mubr.msk.f32.vlgmr.msra.gmra.mrb[0].mxu0 %vm752_vm1, %v6167_v20 }
 0x24c   :  { %6292 = vmatprep.mubr.msk.f32.mxu0 %vm752_vm1, %v700_v34  ;;  %6296 = vmatpush3.msra.mxu0 %v5518_v32  ;;  %v6176_v38 = vpop.f32.mrb[74].mxu1  ;;  %v2430_v32 = vld [vmem:[%s8062_s6] sm:$0x1] }
 0x24d   :  { %v720_v39 = vpop.f32.mrb[75].mxu1  ;;  %6303 = vmatprep.subr.mxu0 %v5523_v37 }
 0x24f   :  { %6293 = vmatmul.mubr.msk.f32.gmra.mrb[2].mxu0 %vm752_vm1, %v6170_v33 }
 0x250   :  { %6297 = vmatprep.mubr.msk.f32.mxu0 %vm752_vm1, %v710_v36  ;;  %v6179_v40 = vpop.f32.mrb[76].mxu1 }
 0x251   :  { %v730_v41 = vpop.f32.mrb[77].mxu1 }
 0x253   :  { %6298 = vmatmul.mubr.msk.f32.vlgmr.msra.gmra.mrb[0].mxu0 %vm752_vm1, %v6173_v35 }
 0x254   :  { %6300 = vmatprep.mubr.msk.f32.mxu0 %vm752_vm1, %v720_v39  ;;  %6304 = vmatpush3.msra.mxu0 %v5523_v37  ;;  %v6182_v42 = vpop.f32.mrb[78].mxu1 }
 0x255   :  { %v740_v43 = vpop.f32.mrb[79].mxu1  ;;  %6701 = vmatprep.subr.bf16.mxu0 %v6948_v45 }
 0x257   :  { %6301 = vmatmul.mubr.msk.f32.gmra.mrb[2].mxu0 %vm752_vm1, %v6176_v38 }
 0x258   :  { %6305 = vmatprep.mubr.msk.f32.mxu0 %vm752_vm1, %v730_v41 }
 0x25b   :  { %6306 = vmatmul.mubr.msk.f32.vlgmr.msra.gmra.mrb[0].mxu0 %vm752_vm1, %v6179_v40 }
 0x25c   :  { %6308 = vmatprep.mubr.msk.f32.mxu0 %vm752_vm1, %v740_v43  ;;  %6703 = vmatpush3.bf16.msra.mxu0 %v6702_v48 }
 0x25d   :  { %6704 = vmatprep.subr.bf16.mxu0 %v6948_v45 }
 0x25f   :  { %6309 = vmatmul.mubr.msk.f32.gmra.mrb[2].mxu0 %vm752_vm1, %v6182_v42 }
 0x32e   :  { %v6307_v49 = vpop.f32.mrb[0].mxu0 }
 0x32f   :  { %v2390_v50 = vsel %vm74_vm0, %v6307_v49, 0.0  ;;  %v2366_v51 = vpop.f32.mrb[1].mxu0 }
 0x330   :  { %v2389_v52 = vsel %vm74_vm0, %v2366_v51, 0.0 }
 0x331   :  { %v2391_v53 = vadd.f32 %v2390_v50, %v2389_v52 }
 0x332   :  { %v6310_v54 = vpop.f32.mrb[2].mxu0 }
 0x333   :  { %v2376_v55 = vpop.f32.mrb[3].mxu0  ;;  %v2394_v58 = vsel %vm74_vm0, %v6310_v54, 0.0 }
 0x334   :  { %v2392_v56 = vsel %vm74_vm0, %v2376_v55, 0.0 }
 0x335   :  { %v2393_v57 = vadd.f32 %v2392_v56, %v2391_v53 }
 0x337   :  { %v2395_v59 = vadd.f32 %v2394_v58, %v2393_v57 }
 0x339   :  { %v2396_v60 = vrot.slane %v2395_v59, 4 }
 0x33b   :  { %v2397_v61 = vadd.f32 %v2396_v60, %v2395_v59  ;;  %v2466_v60 = vld [vmem:[%s8059_s7 + $0x28] sm:$0xff] }
 0x33d   :  { %v2398_v62 = vrot.slane %v2397_v61, 2 }
 0x33f   :  { %v2399_v63 = vadd.f32 %v2398_v62, %v2397_v61  ;;  %v2467_v61 = vld [vmem:[%s8059_s7 + $0x30] sm:$0xff]  ;;  %v2468_v62 = vld [vmem:[%s8059_s7 + $0x38] sm:$0xff] }
 0x341   :  { %v2400_v0 = vrot.slane %v2399_v63, 1 }
 0x343   :  { %v2401_v1 = vadd.f32 %v2400_v0, %v2399_v63  ;;  %v2469_v63 = vld [vmem:[%s8059_s7 + $0x40] sm:$0xff]  ;;  %v2470_v0 = vld [vmem:[%s8059_s7 + $0x48] sm:$0xff] }
 0x345   :  { %v2403_v2 = vmul.f32 0.03125, %v2401_v1  ;;  %v2471_v1 = vld [vmem:[%s8059_s7 + $0x50] sm:$0xff] }
 0x347   :  { %v2404_v3 = vsub.f32 %v2366_v51, %v2403_v2  ;;  %v2405_v4 = vsub.f32 %v6307_v49, %v2403_v2  ;;  %v2406_v5 = vsub.f32 %v2376_v55, %v2403_v2  ;;  %v2407_v6 = vsub.f32 %v6310_v54, %v2403_v2 }
 0x349   :  { %v2408_v7 = vmul.f32 %v2404_v3, %v2404_v3  ;;  %v2409_v8 = vmul.f32 %v2405_v4, %v2405_v4  ;;  %v2410_v9 = vmul.f32 %v2406_v5, %v2406_v5  ;;  %v2411_v10 = vmul.f32 %v2407_v6, %v2407_v6  ;;  %v2473_v3 = vld [vmem:[%s8059_s7 + $0x60] sm:$0xff]  ;;  %v2474_v4 = vld [vmem:[%s8059_s7 + $0x68] sm:$0xff]  ;;  %v2475_v5 = vld [vmem:[%s8059_s7 + $0x70] sm:$0xff] }
 0x34a   :  { %v2476_v6 = vld [vmem:[%s8059_s7 + $0x78] sm:$0xff] }
 0x34b   :  { %v2412_v11 = vsel %vm74_vm0, %v2408_v7, 0.0  ;;  %v2413_v12 = vsel %vm74_vm0, %v2409_v8, 0.0  ;;  %v2415_v14 = vsel %vm74_vm0, %v2410_v9, 0.0  ;;  %v2417_v16 = vsel %vm74_vm0, %v2411_v10, 0.0  ;;  %v2671_v8 = vld [vmem:[%s8060_s8] sm:$0xff]  ;;  %v2672_v9 = vld [vmem:[%s8060_s8 + $0x8] sm:$0xff] }
 0x34c   :  { %v2414_v13 = vadd.f32 %v2413_v12, %v2412_v11  ;;  %v6950_v7 = vmov 0.0   ;;  %v6705_v10 = vpack.c.bf16 %v2672_v9, %v2671_v8  ;;  %v3942_v8 = vld [vmem:[%s8063_s11] sm:$0xff] }
 0x34d   :  { %6347 = vmatprep.mubr.msk.f32.mxu0 %vm6949_vm3, %v6950_v7  ;;  %v3950_v9 = vld [vmem:[%s8063_s11 + $0x40] sm:$0xff] }
 0x34e   :  { %v2416_v15 = vadd.f32 %v2415_v14, %v2414_v13  ;;  %v5548_v13 = vld [vmem:[%s8060_s8 + $0x20] sm:$0xff]  ;;  %v5549_v14 = vld [vmem:[%s8060_s8 + $0x28] sm:$0xff] }
 0x350   :  { %v2418_v17 = vadd.f32 %v2417_v16, %v2416_v15 }
 0x352   :  { %v2419_v18 = vrot.slane %v2418_v17, 4 }
 0x354   :  { %v2420_v19 = vadd.f32 %v2419_v18, %v2418_v17  ;;  %v6708_v17 = vpack.c.bf16 %v5549_v14, %v5548_v13 }
 0x356   :  { %v2421_v21 = vrot.slane %v2420_v19, 2 }
 0x358   :  { %v2422_v22 = vadd.f32 %v2421_v21, %v2420_v19  ;;  %v5551_v21 = vld [vmem:[%s8060_s8 + $0x30] sm:$0xff] }
 0x35a   :  { %v2423_v23 = vrot.slane %v2422_v22, 1 }
 0x35c   :  { %v2424_v24 = vadd.f32 %v2423_v23, %v2422_v22  ;;  %v5552_v22 = vld [vmem:[%s8060_s8 + $0x38] sm:$0xff] }
 0x35e   :  { %v2425_v25 = vmul.f32 0.03125, %v2424_v24 }
 0x360   :  { %v2427_v26 = vadd.f32 1e-05, %v2425_v25  ;;  %v6711_v25 = vpack.c.bf16 %v5552_v22, %v5551_v21 }
 0x362   :  { %6940 = vrsqrt.f32 %v2427_v26 }
 0x36c   :  { %v6941_v20 = vpop.eup %6940 }
 0x36d   :  { %v2429_v31 = vmul.f32 %v6941_v20, %v2426_v29  ;;  %v5555_v29 = vld [vmem:[%s8060_s8 + $0x48] sm:$0xff] }
 0x36f   :  { %v2431_v33 = vmul.f32 %v2429_v31, %v2403_v2  ;;  %v2437_v34 = vrot.slane %v2429_v31, %v7444_v30  ;;  %v2472_v2 = vld [vmem:[%s8059_s7 + $0x58] sm:$0xff] }
 0x371   :  { %v2432_v35 = vsub.f32 %v2430_v32, %v2431_v33  ;;  %v2441_v36 = vmul.f32 %v2437_v34, %v2376_v55  ;;  %v2439_v37 = vmul.f32 %v2437_v34, %v2366_v51  ;;  %v2440_v38 = vmul.f32 %v6307_v49, %v2437_v34  ;;  %v2462_v49 = vld [vmem:[%s8059_s7 + $0x8] sm:$0xff]  ;;  %v2463_v51 = vld [vmem:[%s8059_s7 + $0x10] sm:$0xff]  ;;  %v2465_v55 = vld [vmem:[%s8059_s7 + $0x20] sm:$0xff] }
 0x372   :  { %v2442_v39 = vmul.f32 %v6310_v54, %v2437_v34  ;;  %v2464_v54 = vld [vmem:[%s8059_s7 + $0x18] sm:$0xff]  ;;  %v6714_v32 = vpack.c.bf16 %v5555_v29, %v5554_v28 }
 0x373   :  { %v2447_v40 = vrot.slane %v2432_v35, %v7444_v30  ;;  %v5557_v35 = vld [vmem:[%s8060_s8 + $0x50] sm:$0xff] }
 0x375   :  { %v2451_v41 = vadd.f32 %v2447_v40, %v2441_v36  ;;  %v2449_v42 = vadd.f32 %v2447_v40, %v2439_v37  ;;  %v2450_v43 = vadd.f32 %v2447_v40, %v2440_v38  ;;  %v2452_v44 = vadd.f32 %v2447_v40, %v2442_v39  ;;  %v5558_v36 = vld [vmem:[%s8060_s8 + $0x58] sm:$0xff]  ;;  %v5560_v40 = vld [vmem:[%s8060_s8 + $0x60] sm:$0xff] }
 0x376   :  { %v6717_v39 = vpack.c.bf16 %v5558_v36, %v5557_v35  ;;  %v3923_v35 = vld [vmem:[%s8065_s10] sm:$0x1] }
 0x377   :  { %v2455_v46 = vmul.f32 0.2, %v2451_v41  ;;  %v2453_v47 = vmul.f32 0.2, %v2449_v42  ;;  %v2454_v48 = vmul.f32 0.2, %v2450_v43 }
 0x378   :  { %v2456_v50 = vmul.f32 0.2, %v2452_v44 }
 0x379   :  { %v2457_v52 = vmax.f32 %v2449_v42, %v2453_v47  ;;  %v2458_v53 = vmax.f32 %v2450_v43, %v2454_v48  ;;  %v2459_v56 = vmax.f32 %v2451_v41, %v2455_v46  ;;  %v5561_v41 = vld [vmem:[%s8060_s8 + $0x68] sm:$0xff]  ;;  %v5563_v43 = vld [vmem:[%s8060_s8 + $0x70] sm:$0xff]  ;;  %v5566_v47 = vld [vmem:[%s8060_s8 + $0x80] sm:$0xff] }
 0x37a   :  { %v2460_v57 = vmax.f32 %v2452_v44, %v2456_v50  ;;  %v6720_v42 = vpack.c.bf16 %v5561_v41, %v5560_v40  ;;  %v5564_v44 = vld [vmem:[%s8060_s8 + $0x78] sm:$0xff]  ;;  %v5567_v48 = vld [vmem:[%s8060_s8 + $0x88] sm:$0xff] }
 0x37b   :  { %v6693_v58 = vpack.c.bf16 %v2458_v53, %v2457_v52  ;;  %v6723_v46 = vpack.c.bf16 %v5564_v44, %v5563_v43  ;;  %v6726_v50 = vpack.c.bf16 %v5567_v48, %v5566_v47  ;;  %v5569_v52 = vld [vmem:[%s8060_s8 + $0x90] sm:$0xff]  ;;  %v5570_v53 = vld [vmem:[%s8060_s8 + $0x98] sm:$0xff]  ;;  %v5606_v43 = vld [vmem:[%s8066_s12 + $0x20] sm:$0xff] }
 0x37c   :  { %v6697_v59 = vpack.c.bf16 %v2460_v57, %v2459_v56  ;;  %v6729_v56 = vpack.c.bf16 %v5570_v53, %v5569_v52  ;;  %v5572_v57 = vld [vmem:[%s8060_s8 + $0xa0] sm:$0xff]  ;;  %v4152_v48 = vld [vmem:[%s8066_s12 + $0x8] sm:$0xff]  ;;  %v3944_v52 = vld [vmem:[%s8063_s11 + $0x10] sm:$0xff] }
 0x37d   :  { %6694 = vmatprep.subr.bf16.mxu1 %v6693_v58  ;;  %v4151_v47 = vld [vmem:[%s8066_s12] sm:$0xff]  ;;  %v3952_v53 = vld [vmem:[%s8063_s11 + $0x50] sm:$0xff] }
 0x37e   :  { %6696 = vmatpush3.bf16.msra.mxu1 %v6693_v58  ;;  %v5573_v58 = vld [vmem:[%s8060_s8 + $0xa8] sm:$0xff] }
 0x37f   :  { %6698 = vmatprep.subr.bf16.mxu1 %v6697_v59 }
 0x382   :  { %6700 = vmatpush3.bf16.msra.mxu1 %v6697_v59  ;;  %v6732_v59 = vpack.c.bf16 %v5573_v58, %v5572_v57  ;;  %v6756_v57 = vpack.c.bf16 %v4152_v48, %v4151_v47  ;;  %v5608_v58 = vld [vmem:[%s8066_s12 + $0x30] sm:$0xff]  ;;  %v5637_v47 = vld [vmem:[%s8066_s12 + $0xe0] sm:$0xff]  ;;  %v5638_v48 = vld [vmem:[%s8066_s12 + $0xe8] sm:$0xff] }
 0x385   :  { %6320 = vmatmul.mubr.msk.f32.vlgmr.msra.gmra.mrb[80].mxu1 %vm2477_vm2, %v2462_v49  ;;  %v5575_v49 = vld [vmem:[%s8060_s8 + $0xb0] sm:$0xff] }
 0x386   :  { %6322 = vmatprep.mubr.msk.f32.mxu1 %vm2477_vm2, %v2463_v51  ;;  %v5576_v51 = vld [vmem:[%s8060_s8 + $0xb8] sm:$0xff] }
 0x389   :  { %6323 = vmatmul.mubr.msk.f32.gmra.mrb[82].mxu1 %vm2477_vm2, %v2464_v54  ;;  %v6735_v54 = vpack.c.bf16 %v5576_v51, %v5575_v49  ;;  %v4153_v49 = vld [vmem:[%s8066_s12 + $0x10] sm:$0xff]  ;;  %v4154_v51 = vld [vmem:[%s8066_s12 + $0x18] sm:$0xff] }
 0x38a   :  { %6325 = vmatprep.mubr.msk.f32.mxu1 %vm2477_vm2, %v2465_v55  ;;  %v5578_v55 = vld [vmem:[%s8060_s8 + $0xc0] sm:$0xff] }
 0x38d   :  { %6326 = vmatmul.mubr.msk.f32.gmra.mrb[84].mxu1 %vm2477_vm2, %v2466_v60  ;;  %v5579_v60 = vld [vmem:[%s8060_s8 + $0xc8] sm:$0xff] }
 0x38e   :  { %6328 = vmatprep.mubr.msk.f32.mxu1 %vm2477_vm2, %v2467_v61  ;;  %v6738_v61 = vpack.c.bf16 %v5579_v60, %v5578_v55  ;;  %v3953_v55 = vld [vmem:[%s8063_s11 + $0x58] sm:$0xff]  ;;  %v3946_v60 = vld [vmem:[%s8063_s11 + $0x20] sm:$0xff] }
 0x391   :  { %6329 = vmatmul.mubr.msk.f32.gmra.mrb[86].mxu1 %vm2477_vm2, %v2468_v62  ;;  %v5581_v62 = vld [vmem:[%s8060_s8 + $0xd0] sm:$0xff] }
 0x392   :  { %6331 = vmatprep.mubr.msk.f32.mxu1 %vm2477_vm2, %v2469_v63  ;;  %v5582_v63 = vld [vmem:[%s8060_s8 + $0xd8] sm:$0xff] }
 0x395   :  { %6332 = vmatmul.mubr.msk.f32.gmra.mrb[88].mxu1 %vm2477_vm2, %v2470_v0  ;;  %v6741_v0 = vpack.c.bf16 %v5582_v63, %v5581_v62  ;;  %v6759_v63 = vpack.c.bf16 %v4154_v51, %v4153_v49  ;;  %v5639_v49 = vld [vmem:[%s8066_s12 + $0xf0] sm:$0xff]  ;;  %v5640_v51 = vld [vmem:[%s8066_s12 + $0xf8] sm:$0xff] }
 0x396   :  { %6334 = vmatprep.mubr.msk.f32.mxu1 %vm2477_vm2, %v2471_v1  ;;  %v5584_v1 = vld [vmem:[%s8060_s8 + $0xe0] sm:$0xff] }
 0x399   :  { %6335 = vmatmul.mubr.msk.f32.gmra.mrb[90].mxu1 %vm2477_vm2, %v2472_v2  ;;  %v5585_v2 = vld [vmem:[%s8060_s8 + $0xe8] sm:$0xff] }
 0x39a   :  { %6337 = vmatprep.mubr.msk.f32.mxu1 %vm2477_vm2, %v2473_v3  ;;  %v6744_v3 = vpack.c.bf16 %v5585_v2, %v5584_v1  ;;  %v3955_v1 = vld [vmem:[%s8063_s11 + $0x68] sm:$0xff]  ;;  %v3948_v2 = vld [vmem:[%s8063_s11 + $0x30] sm:$0xff] }
 0x39d   :  { %6338 = vmatmul.mubr.msk.f32.gmra.mrb[92].mxu1 %vm2477_vm2, %v2474_v4  ;;  %v5587_v4 = vld [vmem:[%s8060_s8 + $0xf0] sm:$0xff] }
 0x39e   :  { %6340 = vmatprep.mubr.msk.f32.mxu1 %vm2477_vm2, %v2475_v5  ;;  %v5588_v5 = vld [vmem:[%s8060_s8 + $0xf8] sm:$0xff] }
 0x3a1   :  { %6341 = vmatmul.mubr.msk.f32.gmra.mrb[94].mxu1 %vm2477_vm2, %v2476_v6  ;;  %v6747_v6 = vpack.c.bf16 %v5588_v5, %v5587_v4  ;;  %v3949_v4 = vld [vmem:[%s8063_s11 + $0x38] sm:$0xff] }
 0x3a2   :  { %6469 = vmatprep.mubr.msk.f32.mxu1 %vm752_vm1, %v3950_v9  ;;  %v3957_v5 = vld [vmem:[%s8063_s11 + $0x78] sm:$0xff]  ;;  %v5617_v9 = vld [vmem:[%s8066_s12 + $0x60] sm:$0xff] }
 0x458   :  { %v6321_v11 = vpop.f32.mrb[80].mxu1 }
 0x459   :  { %6348 = vmatmul.mubr.msk.f32.vlgmr.msra.gmra.mrb[4].mxu0 %vm74_vm0, %v6321_v11  ;;  %v2592_v12 = vpop.f32.mrb[81].mxu1 }
 0x45a   :  { %6706 = vmatpush3.bf16.msra.mxu0 %v6705_v10  ;;  %6354 = vmatprep.mubr.msk.f32.mxu0 %vm6949_vm3, %v6950_v7 }
 0x45b   :  { %6707 = vmatprep.subr.bf16.mxu0 %v6948_v45 }
 0x45c   :  { %v6324_v15 = vpop.f32.mrb[82].mxu1 }
 0x45d   :  { %v2602_v16 = vpop.f32.mrb[83].mxu1 }
 0x460   :  { %v6327_v18 = vpop.f32.mrb[84].mxu1 }
 0x461   :  { %6355 = vmatmul.mubr.msk.f32.vlgmr.msra.gmra.mrb[4].mxu0 %vm74_vm0, %v2592_v12  ;;  %v2612_v19 = vpop.f32.mrb[85].mxu1 }
 0x462   :  { %6709 = vmatpush3.bf16.msra.mxu0 %v6708_v17  ;;  %6361 = vmatprep.mubr.msk.f32.mxu0 %vm6949_vm3, %v6950_v7 }
 0x463   :  { %6710 = vmatprep.subr.bf16.mxu0 %v6948_v45 }
 0x464   :  { %v6330_v23 = vpop.f32.mrb[86].mxu1 }
 0x465   :  { %v2622_v24 = vpop.f32.mrb[87].mxu1 }
 0x468   :  { %v6333_v26 = vpop.f32.mrb[88].mxu1 }
 0x469   :  { %6362 = vmatmul.mubr.msk.f32.vlgmr.msra.gmra.mrb[4].mxu0 %vm74_vm0, %v2602_v16  ;;  %v2632_v27 = vpop.f32.mrb[89].mxu1 }
 0x46a   :  { %6712 = vmatpush3.bf16.msra.mxu0 %v6711_v25  ;;  %6368 = vmatprep.mubr.msk.f32.mxu0 %vm6949_vm3, %v6950_v7 }
 0x46b   :  { %6713 = vmatprep.subr.bf16.mxu0 %v6948_v45 }
 0x46c   :  { %v7549_v20 = vpop.f32.mrb[90].mxu1 }
 0x46d   :  { %v2642_v31 = vpop.f32.mrb[91].mxu1 }
 0x470   :  { %v7551_v33 = vpop.f32.mrb[92].mxu1 }
 0x471   :  { %6369 = vmatmul.mubr.msk.f32.vlgmr.msra.gmra.mrb[4].mxu0 %vm74_vm0, %v6324_v15  ;;  %v7554_v34 = vpop.f32.mrb[93].mxu1 }
 0x472   :  { %6715 = vmatpush3.bf16.msra.mxu0 %v6714_v32  ;;  %6375 = vmatprep.mubr.msk.f32.mxu0 %vm6949_vm3, %v6950_v7  ;;  %v3919_v32 = vld [vmem:[%s8064_s9] sm:$0x1] }
 0x473   :  { %6716 = vmatprep.subr.bf16.mxu0 %v6948_v45 }
 0x474   :  { %v7565_v37 = vpop.f32.mrb[94].mxu1 }
 0x475   :  { %v7567_v38 = vpop.f32.mrb[95].mxu1 }
 0x479   :  { %6376 = vmatmul.mubr.msk.f32.vlgmr.msra.gmra.mrb[4].mxu0 %vm74_vm0, %v2612_v19 }
 0x47a   :  { %6718 = vmatpush3.bf16.msra.mxu0 %v6717_v39  ;;  %6382 = vmatprep.mubr.msk.f32.mxu0 %vm6949_vm3, %v6950_v7 }
 0x47b   :  { %6719 = vmatprep.subr.bf16.mxu0 %v6948_v45 }
 0x481   :  { %6383 = vmatmul.mubr.msk.f32.vlgmr.msra.gmra.mrb[4].mxu0 %vm74_vm0, %v6327_v18 }
 0x482   :  { %6721 = vmatpush3.bf16.msra.mxu0 %v6720_v42  ;;  %6389 = vmatprep.mubr.msk.f32.mxu0 %vm6949_vm3, %v6950_v7 }
 0x483   :  { %6722 = vmatprep.subr.bf16.mxu0 %v6948_v45 }
 0x489   :  { %6390 = vmatmul.mubr.msk.f32.vlgmr.msra.gmra.mrb[4].mxu0 %vm74_vm0, %v2622_v24 }
 0x48a   :  { %6724 = vmatpush3.bf16.msra.mxu0 %v6723_v46  ;;  %6396 = vmatprep.mubr.msk.f32.mxu0 %vm6949_vm3, %v6950_v7  ;;  %v5607_v46 = vld [vmem:[%s8066_s12 + $0x28] sm:$0xff] }
 0x48b   :  { %6725 = vmatprep.subr.bf16.mxu0 %v6948_v45 }
 0x491   :  { %6397 = vmatmul.mubr.msk.f32.vlgmr.msra.gmra.mrb[4].mxu0 %vm74_vm0, %v6330_v23 }
 0x492   :  { %6727 = vmatpush3.bf16.msra.mxu0 %v6726_v50  ;;  %6403 = vmatprep.mubr.msk.f32.mxu0 %vm6949_vm3, %v6950_v7  ;;  %v3951_v50 = vld [vmem:[%s8063_s11 + $0x48] sm:$0xff] }
 0x493   :  { %6728 = vmatprep.subr.bf16.mxu0 %v6948_v45 }
 0x499   :  { %6404 = vmatmul.mubr.msk.f32.vlgmr.msra.gmra.mrb[4].mxu0 %vm74_vm0, %v2632_v27 }
 0x49a   :  { %6730 = vmatpush3.bf16.msra.mxu0 %v6729_v56  ;;  %6410 = vmatprep.mubr.msk.f32.mxu0 %vm6949_vm3, %v6950_v7  ;;  %v6750_v56 = vpack.c.bf16 %v5607_v46, %v5606_v43  ;;  %v5633_v46 = vld [vmem:[%s8066_s12 + $0xc8] sm:$0xff] }
 0x49b   :  { %6731 = vmatprep.subr.bf16.mxu0 %v6948_v45 }
 0x4a1   :  { %6411 = vmatmul.mubr.msk.f32.vlgmr.msra.gmra.mrb[4].mxu0 %vm74_vm0, %v6333_v26 }
 0x4a2   :  { %6733 = vmatpush3.bf16.msra.mxu0 %v6732_v59  ;;  %6417 = vmatprep.mubr.msk.f32.mxu0 %vm6949_vm3, %v6950_v7  ;;  %v5609_v59 = vld [vmem:[%s8066_s12 + $0x38] sm:$0xff] }
 0x4a3   :  { %6734 = vmatprep.subr.bf16.mxu0 %v6948_v45  ;;  %v6753_v62 = vpack.c.bf16 %v5609_v59, %v5608_v58  ;;  %v5634_v58 = vld [vmem:[%s8066_s12 + $0xd0] sm:$0xff]  ;;  %v5635_v59 = vld [vmem:[%s8066_s12 + $0xd8] sm:$0xff] }
 0x4a9   :  { %6418 = vmatmul.mubr.msk.f32.vlgmr.msra.gmra.mrb[4].mxu0 %vm74_vm0, %v2642_v31 }
 0x4aa   :  { %6736 = vmatpush3.bf16.msra.mxu0 %v6735_v54  ;;  %6424 = vmatprep.mubr.msk.f32.mxu0 %vm6949_vm3, %v6950_v7  ;;  %v3945_v54 = vld [vmem:[%s8063_s11 + $0x18] sm:$0xff] }
 0x4ab   :  { %6737 = vmatprep.subr.bf16.mxu0 %v6948_v45 }
 0x4b1   :  { %6425 = vmatmul.mubr.msk.f32.vlgmr.msra.gmra.mrb[4].mxu0 %vm74_vm0, %v7549_v20 }
 0x4b2   :  { %6739 = vmatpush3.bf16.msra.mxu0 %v6738_v61  ;;  %6431 = vmatprep.mubr.msk.f32.mxu0 %vm6949_vm3, %v6950_v7  ;;  %v3954_v61 = vld [vmem:[%s8063_s11 + $0x60] sm:$0xff] }
 0x4b3   :  { %6740 = vmatprep.subr.bf16.mxu0 %v6948_v45 }
 0x4b9   :  { %6432 = vmatmul.mubr.msk.f32.vlgmr.msra.gmra.mrb[4].mxu0 %vm74_vm0, %v7554_v34 }
 0x4ba   :  { %6742 = vmatpush3.bf16.msra.mxu0 %v6741_v0  ;;  %6438 = vmatprep.mubr.msk.f32.mxu0 %vm6949_vm3, %v6950_v7  ;;  %v3947_v0 = vld [vmem:[%s8063_s11 + $0x28] sm:$0xff] }
 0x4bb   :  { %6743 = vmatprep.subr.bf16.mxu0 %v6948_v45 }
 0x4c1   :  { %6439 = vmatmul.mubr.msk.f32.vlgmr.msra.gmra.mrb[4].mxu0 %vm74_vm0, %v7551_v33 }
 0x4c2   :  { %6745 = vmatpush3.bf16.msra.mxu0 %v6744_v3  ;;  %6445 = vmatprep.mubr.msk.f32.mxu0 %vm6949_vm3, %v6950_v7  ;;  %v3956_v3 = vld [vmem:[%s8063_s11 + $0x70] sm:$0xff] }
 0x4c3   :  { %6746 = vmatprep.subr.bf16.mxu0 %v6948_v45 }
 0x4c9   :  { %6446 = vmatmul.mubr.msk.f32.vlgmr.msra.gmra.mrb[4].mxu0 %vm74_vm0, %v7567_v38 }
 0x4ca   :  { %6748 = vmatpush3.bf16.msra.mxu0 %v6747_v6  ;;  %6452 = vmatprep.mubr.msk.f32.mxu0 %vm6949_vm3, %v6950_v7  ;;  %v5612_v6 = vld [vmem:[%s8066_s12 + $0x40] sm:$0xff] }
 0x4d1   :  { %6453 = vmatmul.mubr.msk.f32.vlgmr.msra.gmra.mrb[4].mxu0 %vm74_vm0, %v7565_v37 }
 0x4d2   :  { %6457 = vmatprep.mubr.msk.f32.mxu0 %vm752_vm1, %v3942_v8  ;;  %v5613_v8 = vld [vmem:[%s8066_s12 + $0x48] sm:$0xff] }
 0x5a4   :  { %v3895_v10 = vpop.f32.mrb[4].mxu0 }
 0x5a5   :  { %v3900_v11 = vsel %vm2477_vm2, %v3895_v10, 0.0  ;;  %v6454_v12 = vpop.f32.mrb[5].mxu0 }
 0x5a6   :  { %v3901_v13 = vrot.slane %v3900_v11, 4 }
 0x5a8   :  { %v3902_v14 = vadd.f32 %v3901_v13, %v3900_v11  ;;  %v6762_v11 = vpack.c.bf16 %v5613_v8, %v5612_v6  ;;  %v5614_v13 = vld [vmem:[%s8066_s12 + $0x50] sm:$0xff] }
 0x5aa   :  { %v3903_v15 = vrot.slane %v3902_v14, 2 }
 0x5ac   :  { %v3904_v16 = vadd.f32 %v3903_v15, %v3902_v14  ;;  %v5615_v14 = vld [vmem:[%s8066_s12 + $0x58] sm:$0xff] }
 0x5ae   :  { %v3905_v17 = vrot.slane %v3904_v16, 1 }
 0x5b0   :  { %v3906_v18 = vadd.f32 %v3905_v17, %v3904_v16  ;;  %v5619_v16 = vld [vmem:[%s8066_s12 + $0x70] sm:$0xff]  ;;  %v5620_v17 = vld [vmem:[%s8066_s12 + $0x78] sm:$0xff] }
 0x5b2   :  { %v3908_v19 = vmul.f32 0.125, %v3906_v18 }
 0x5b4   :  { %v3909_v21 = vsub.f32 %v3895_v10, %v3908_v19 }
 0x5b6   :  { %v3910_v22 = vmul.f32 %v3909_v21, %v3909_v21 }
 0x5b8   :  { %v3911_v23 = vsel %vm2477_vm2, %v3910_v22, 0.0  ;;  %v6765_v22 = vpack.c.bf16 %v5615_v14, %v5614_v13 }
 0x5b9   :  { %v3912_v24 = vrot.slane %v3911_v23, 4 }
 0x5bb   :  { %v3913_v25 = vadd.f32 %v3912_v24, %v3911_v23  ;;  %v6771_v23 = vpack.c.bf16 %v5620_v17, %v5619_v16  ;;  %v5622_v24 = vld [vmem:[%s8066_s12 + $0x80] sm:$0xff]  ;;  %v5655_v16 = vld [vmem:[%s8066_s12 + $0x158] sm:$0xff]  ;;  %v5659_v17 = vld [vmem:[%s8066_s12 + $0x170] sm:$0xff] }
 0x5bd   :  { %v3914_v26 = vrot.slane %v3913_v25, 2 }
 0x5bf   :  { %v3915_v27 = vadd.f32 %v3914_v26, %v3913_v25  ;;  %v5623_v25 = vld [vmem:[%s8066_s12 + $0x88] sm:$0xff] }
 0x5c1   :  { %v3916_v28 = vrot.slane %v3915_v27, 1 }
 0x5c3   :  { %v3917_v29 = vadd.f32 %v3916_v28, %v3915_v27  ;;  %v5627_v27 = vld [vmem:[%s8066_s12 + $0xa0] sm:$0xff]  ;;  %v5628_v28 = vld [vmem:[%s8066_s12 + $0xa8] sm:$0xff] }
 0x5c5   :  { %v3918_v20 = vmul.f32 0.125, %v3917_v29 }
 0x5c7   :  { %v3920_v31 = vadd.f32 1e-05, %v3918_v20 }
 0x5c9   :  { %6942 = vrsqrt.f32 %v3920_v31 }
 0x5d3   :  { %v6943_v33 = vpop.eup %6942 }
 0x5d4   :  { %v3922_v34 = vmul.f32 %v6943_v33, %v3919_v32  ;;  %v6774_v32 = vpack.c.bf16 %v5623_v25, %v5622_v24  ;;  %v6780_v33 = vpack.c.bf16 %v5628_v28, %v5627_v27  ;;  %v5662_v24 = vld [vmem:[%s8066_s12 + $0x180] sm:$0xff]  ;;  %v5663_v25 = vld [vmem:[%s8066_s12 + $0x188] sm:$0xff]  ;;  %v5664_v28 = vld [vmem:[%s8066_s12 + $0x190] sm:$0xff] }
 0x5d6   :  { %v3924_v36 = vmul.f32 %v3922_v34, %v3908_v19  ;;  %v3930_v37 = vrot.slane %v3922_v34, %v7444_v30  ;;  %v5624_v34 = vld [vmem:[%s8066_s12 + $0x90] sm:$0xff] }
 0x5d8   :  { %v3925_v38 = vsub.f32 %v3923_v35, %v3924_v36  ;;  %v3932_v39 = vmul.f32 %v3930_v37, %v3895_v10  ;;  %v5618_v10 = vld [vmem:[%s8066_s12 + $0x68] sm:$0xff]  ;;  %v5625_v35 = vld [vmem:[%s8066_s12 + $0x98] sm:$0xff]  ;;  %v5629_v37 = vld [vmem:[%s8066_s12 + $0xb0] sm:$0xff] }
 0x5d9   :  { %v6768_v12 = vpack.c.bf16 %v5618_v10, %v5617_v9  ;;  %v5652_v9 = vld [vmem:[%s8066_s12 + $0x140] sm:$0xff]  ;;  %v5653_v10 = vld [vmem:[%s8066_s12 + $0x148] sm:$0xff] }
 0x5da   :  { %v3937_v40 = vrot.slane %v3925_v38, %v7444_v30  ;;  %v3943_v30 = vld [vmem:[%s8063_s11 + $0x8] sm:$0xff]  ;;  %v5630_v38 = vld [vmem:[%s8066_s12 + $0xb8] sm:$0xff]  ;;  %v6810_v13 = vpack.c.bf16 %v5653_v10, %v5652_v9 }
 0x5db   :  { %v6783_v43 = vpack.c.bf16 %v5630_v38, %v5629_v37  ;;  %v5673_v37 = vld [vmem:[%s8066_s12 + $0x1c8] sm:$0xff] }
 0x5dc   :  { %v3939_v41 = vadd.f32 %v3937_v40, %v3932_v39 }
 0x5de   :  { %v3940_v42 = vmul.f32 0.2, %v3939_v41 }
 0x5e0   :  { %v3941_v44 = vmax.f32 %v3939_v41, %v3940_v42  ;;  %v6777_v42 = vpack.c.bf16 %v5625_v35, %v5624_v34 }
 0x5e2   :  { %6455 = vmatprep.subr.mxu0 %v3941_v44  ;;  %6845 = vmatprep.subr.mxu1 %v3941_v44 }
 0x5e3   :  { %6456 = vmatpush3.msra.mxu0 %v3941_v44  ;;  %6846 = vmatpush3.msra.mxu1 %v3941_v44  ;;  %v5632_v44 = vld [vmem:[%s8066_s12 + $0xc0] sm:$0xff] }
 0x5e4   :  { %6458 = vmatmul.mubr.msk.f32.vlgmr.msra.gmra.mrb[6].mxu0 %vm752_vm1, %v3943_v30  ;;  %6470 = vmatmul.mubr.msk.f32.vlgmr.msra.gmra.mrb[96].mxu1 %vm752_vm1, %v3951_v50 }
 0x5e5   :  { %6460 = vmatprep.mubr.msk.f32.mxu0 %vm752_vm1, %v3944_v52  ;;  %6472 = vmatprep.mubr.msk.f32.mxu1 %vm752_vm1, %v3952_v53 }
 0x5e6   :  { %6749 = vmatprep.subr.bf16.mxu1 %v6948_v45  ;;  %6755 = vmatprep.subr.bf16.mxu0 %v6948_v45 }
 0x5e7   :  { %6751 = vmatpush3.bf16.msra.mxu1 %v6750_v56  ;;  %6757 = vmatpush3.bf16.msra.mxu0 %v6756_v57  ;;  %v6786_v56 = vpack.c.bf16 %v5633_v46, %v5632_v44  ;;  %v6792_v57 = vpack.c.bf16 %v5638_v48, %v5637_v47  ;;  %v5679_v44 = vld [vmem:[%s8066_s12 + $0x1f0] sm:$0xff]  ;;  %v5680_v46 = vld [vmem:[%s8066_s12 + $0x1f8] sm:$0xff] }
 0x5e8   :  { %6461 = vmatmul.mubr.msk.f32.gmra.mrb[8].mxu0 %vm752_vm1, %v3945_v54  ;;  %6473 = vmatmul.mubr.msk.f32.gmra.mrb[98].mxu1 %vm752_vm1, %v3953_v55  ;;  %v6789_v54 = vpack.c.bf16 %v5635_v59, %v5634_v58  ;;  %v6795_v55 = vpack.c.bf16 %v5640_v51, %v5639_v49  ;;  %v6843_v48 = vpack.c.bf16 %v5680_v46, %v5679_v44 }
 0x5e9   :  { %6463 = vmatprep.mubr.msk.f32.mxu0 %vm752_vm1, %v3946_v60  ;;  %6475 = vmatprep.mubr.msk.f32.mxu1 %vm752_vm1, %v3954_v61  ;;  %v5642_v60 = vld [vmem:[%s8066_s12 + $0x100] sm:$0xff]  ;;  %v5643_v61 = vld [vmem:[%s8066_s12 + $0x108] sm:$0xff] }
 0x5ea   :  { %6752 = vmatprep.subr.bf16.mxu1 %v6948_v45  ;;  %6758 = vmatprep.subr.bf16.mxu0 %v6948_v45 }
 0x5eb   :  { %6754 = vmatpush3.bf16.msra.mxu1 %v6753_v62  ;;  %6760 = vmatpush3.bf16.msra.mxu0 %v6759_v63  ;;  %v5647_v62 = vld [vmem:[%s8066_s12 + $0x120] sm:$0xff]  ;;  %v5648_v63 = vld [vmem:[%s8066_s12 + $0x128] sm:$0xff] }
 0x5ec   :  { %6464 = vmatmul.mubr.msk.f32.gmra.mrb[10].mxu0 %vm752_vm1, %v3947_v0  ;;  %6476 = vmatmul.mubr.msk.f32.gmra.mrb[100].mxu1 %vm752_vm1, %v3955_v1  ;;  %v6798_v0 = vpack.c.bf16 %v5643_v61, %v5642_v60  ;;  %v6804_v1 = vpack.c.bf16 %v5648_v63, %v5647_v62 }
 0x5ed   :  { %6466 = vmatprep.mubr.msk.f32.mxu0 %vm752_vm1, %v3948_v2  ;;  %6478 = vmatprep.mubr.msk.f32.mxu1 %vm752_vm1, %v3956_v3  ;;  %v5644_v2 = vld [vmem:[%s8066_s12 + $0x110] sm:$0xff]  ;;  %v5645_v3 = vld [vmem:[%s8066_s12 + $0x118] sm:$0xff] }
 0x5ee   :  { %6761 = vmatprep.subr.bf16.mxu1 %v6948_v45  ;;  %6767 = vmatprep.subr.bf16.mxu0 %v6948_v45  ;;  %v6801_v6 = vpack.c.bf16 %v5645_v3, %v5644_v2 }
 0x5f0   :  { %6467 = vmatmul.mubr.msk.f32.gmra.mrb[12].mxu0 %vm752_vm1, %v3949_v4  ;;  %6479 = vmatmul.mubr.msk.f32.gmra.mrb[102].mxu1 %vm752_vm1, %v3957_v5  ;;  %v5649_v4 = vld [vmem:[%s8066_s12 + $0x130] sm:$0xff]  ;;  %v5650_v5 = vld [vmem:[%s8066_s12 + $0x138] sm:$0xff] }
 0x5f1   :  { %6489 = vmatprep.mubr.msk.f32.mxu1 %vm6949_vm3, %v6950_v7  ;;  %6500 = vmatprep.mubr.msk.f32.mxu0 %vm6949_vm3, %v6950_v7  ;;  %v6807_v8 = vpack.c.bf16 %v5650_v5, %v5649_v4 }
 0x6b7   :  { %v6459_v15 = vpop.f32.mrb[6].mxu0  ;;  %v7810_v18 = vpop.f32.mrb[96].mxu1 }
 0x6b8   :  { %6490 = vmatmul.mubr.msk.f32.vlgmr.msra.gmra.mrb[104].mxu1 %vm2477_vm2, %v6459_v15  ;;  %v4072_v19 = vpop.f32.mrb[7].mxu0  ;;  %v7813_v21 = vpop.f32.mrb[97].mxu1  ;;  %v5654_v15 = vld [vmem:[%s8066_s12 + $0x150] sm:$0xff] }
 0x6b9   :  { %6763 = vmatpush3.bf16.msra.mxu1 %v6762_v11  ;;  %6501 = vmatmul.mubr.msk.f32.vlgmr.msra.gmra.mrb[14].mxu0 %vm2477_vm2, %v4072_v19  ;;  %v5657_v11 = vld [vmem:[%s8066_s12 + $0x160] sm:$0xff]  ;;  %v5660_v19 = vld [vmem:[%s8066_s12 + $0x178] sm:$0xff] }
 0x6ba   :  { %6769 = vmatpush3.bf16.msra.mxu0 %v6768_v12  ;;  %6764 = vmatprep.subr.bf16.mxu1 %v6948_v45  ;;  %v5658_v12 = vld [vmem:[%s8066_s12 + $0x168] sm:$0xff] }
 0x6bb   :  { %6770 = vmatprep.subr.bf16.mxu0 %v6948_v45  ;;  %v6462_v26 = vpop.f32.mrb[8].mxu0  ;;  %6511 = vmatprep.mubr.msk.f32.mxu1 %vm6949_vm3, %v6950_v7  ;;  %v7832_v29 = vpop.f32.mrb[98].mxu1  ;;  %v6816_v14 = vpack.c.bf16 %v5658_v12, %v5657_v11 }
 0x6bc   :  { %v4082_v20 = vpop.f32.mrb[9].mxu0  ;;  %6522 = vmatprep.mubr.msk.f32.mxu0 %vm6949_vm3, %v6950_v7  ;;  %v7836_v31 = vpop.f32.mrb[99].mxu1 }
 0x6bd   :  { %6766 = vmatpush3.bf16.msra.mxu1 %v6765_v22  ;;  %v6813_v22 = vpack.c.bf16 %v5655_v16, %v5654_v15 }
 0x6be   :  { %6772 = vmatpush3.bf16.msra.mxu0 %v6771_v23  ;;  %6773 = vmatprep.subr.bf16.mxu1 %v6948_v45  ;;  %v6819_v23 = vpack.c.bf16 %v5660_v19, %v5659_v17 }
 0x6bf   :  { %6779 = vmatprep.subr.bf16.mxu0 %v6948_v45  ;;  %v6465_v36 = vpop.f32.mrb[10].mxu0  ;;  %v7852_v39 = vpop.f32.mrb[100].mxu1 }
 0x6c0   :  { %6512 = vmatmul.mubr.msk.f32.vlgmr.msra.gmra.mrb[106].mxu1 %vm2477_vm2, %v4082_v20  ;;  %v4092_v40 = vpop.f32.mrb[11].mxu0  ;;  %v7855_v41 = vpop.f32.mrb[101].mxu1  ;;  %v5665_v20 = vld [vmem:[%s8066_s12 + $0x198] sm:$0xff] }
 0x6c1   :  { %6775 = vmatpush3.bf16.msra.mxu1 %v6774_v32  ;;  %6523 = vmatmul.mubr.msk.f32.vlgmr.msra.gmra.mrb[16].mxu0 %vm2477_vm2, %v6462_v26  ;;  %v6822_v26 = vpack.c.bf16 %v5663_v25, %v5662_v24  ;;  %v5669_v32 = vld [vmem:[%s8066_s12 + $0x1b0] sm:$0xff]  ;;  %v6825_v34 = vpack.c.bf16 %v5665_v20, %v5664_v28 }
 0x6c2   :  { %6781 = vmatpush3.bf16.msra.mxu0 %v6780_v33  ;;  %6776 = vmatprep.subr.bf16.mxu1 %v6948_v45  ;;  %v5670_v33 = vld [vmem:[%s8066_s12 + $0x1b8] sm:$0xff] }
 0x6c3   :  { %6782 = vmatprep.subr.bf16.mxu0 %v6948_v45  ;;  %6533 = vmatprep.mubr.msk.f32.mxu1 %vm6949_vm3, %v6950_v7  ;;  %v6468_v30 = vpop.f32.mrb[12].mxu0  ;;  %v7874_v50 = vpop.f32.mrb[102].mxu1  ;;  %v6831_v35 = vpack.c.bf16 %v5670_v33, %v5669_v32 }
 0x6c4   :  { %6544 = vmatprep.mubr.msk.f32.mxu0 %vm6949_vm3, %v6950_v7  ;;  %v4102_v52 = vpop.f32.mrb[13].mxu0  ;;  %v7878_v53 = vpop.f32.mrb[103].mxu1 }
 0x6c5   :  { %6778 = vmatpush3.bf16.msra.mxu1 %v6777_v42  ;;  %v5674_v42 = vld [vmem:[%s8066_s12 + $0x1d0] sm:$0xff] }
 0x6c6   :  { %6784 = vmatpush3.bf16.msra.mxu0 %v6783_v43  ;;  %6785 = vmatprep.subr.bf16.mxu1 %v6948_v45  ;;  %v5675_v43 = vld [vmem:[%s8066_s12 + $0x1d8] sm:$0xff] }
 0x6c7   :  { %6791 = vmatprep.subr.bf16.mxu0 %v6948_v45  ;;  %v6837_v47 = vpack.c.bf16 %v5675_v43, %v5674_v42 }
 0x6c8   :  { %6534 = vmatmul.mubr.msk.f32.vlgmr.msra.gmra.mrb[108].mxu1 %vm2477_vm2, %v4092_v40 }
 0x6c9   :  { %6787 = vmatpush3.bf16.msra.mxu1 %v6786_v56  ;;  %6545 = vmatmul.mubr.msk.f32.vlgmr.msra.gmra.mrb[18].mxu0 %vm2477_vm2, %v6465_v36  ;;  %v5672_v36 = vld [vmem:[%s8066_s12 + $0x1c0] sm:$0xff] }
 0x6ca   :  { %6793 = vmatpush3.bf16.msra.mxu0 %v6792_v57  ;;  %6788 = vmatprep.subr.bf16.mxu1 %v6948_v45  ;;  %v6834_v38 = vpack.c.bf16 %v5673_v37, %v5672_v36 }
 0x6cb   :  { %6794 = vmatprep.subr.bf16.mxu0 %v6948_v45  ;;  %6555 = vmatprep.mubr.msk.f32.mxu1 %vm6949_vm3, %v6950_v7 }
 0x6cc   :  { %6566 = vmatprep.mubr.msk.f32.mxu0 %vm6949_vm3, %v6950_v7 }
 0x6cd   :  { %6790 = vmatpush3.bf16.msra.mxu1 %v6789_v54 }
 0x6ce   :  { %6796 = vmatpush3.bf16.msra.mxu0 %v6795_v55  ;;  %6797 = vmatprep.subr.bf16.mxu1 %v6948_v45 }
 0x6cf   :  { %6803 = vmatprep.subr.bf16.mxu0 %v6948_v45 }
 0x6d0   :  { %6556 = vmatmul.mubr.msk.f32.vlgmr.msra.gmra.mrb[110].mxu1 %vm2477_vm2, %v4102_v52 }
 0x6d1   :  { %6799 = vmatpush3.bf16.msra.mxu1 %v6798_v0  ;;  %6567 = vmatmul.mubr.msk.f32.vlgmr.msra.gmra.mrb[20].mxu0 %vm2477_vm2, %v6468_v30 }
 0x6d2   :  { %6805 = vmatpush3.bf16.msra.mxu0 %v6804_v1  ;;  %6800 = vmatprep.subr.bf16.mxu1 %v6948_v45 }
 0x6d3   :  { %6806 = vmatprep.subr.bf16.mxu0 %v6948_v45  ;;  %6577 = vmatprep.mubr.msk.f32.mxu1 %vm6949_vm3, %v6950_v7 }
 0x6d4   :  { %6588 = vmatprep.mubr.msk.f32.mxu0 %vm6949_vm3, %v6950_v7 }
 0x6d5   :  { %6802 = vmatpush3.bf16.msra.mxu1 %v6801_v6 }
 0x6d6   :  { %6808 = vmatpush3.bf16.msra.mxu0 %v6807_v8  ;;  %6809 = vmatprep.subr.bf16.mxu1 %v6948_v45 }
 0x6d7   :  { %6815 = vmatprep.subr.bf16.mxu0 %v6948_v45 }
 0x6d8   :  { %6578 = vmatmul.mubr.msk.f32.vlgmr.msra.gmra.mrb[112].mxu1 %vm2477_vm2, %v7813_v21  ;;  %v5668_v21 = vld [vmem:[%s8066_s12 + $0x1a8] sm:$0xff] }
 0x6d9   :  { %6811 = vmatpush3.bf16.msra.mxu1 %v6810_v13  ;;  %6589 = vmatmul.mubr.msk.f32.vlgmr.msra.gmra.mrb[22].mxu0 %vm2477_vm2, %v7810_v18  ;;  %v5667_v18 = vld [vmem:[%s8066_s12 + $0x1a0] sm:$0xff] }
 0x6da   :  { %6817 = vmatpush3.bf16.msra.mxu0 %v6816_v14  ;;  %6812 = vmatprep.subr.bf16.mxu1 %v6948_v45  ;;  %v6828_v27 = vpack.c.bf16 %v5668_v21, %v5667_v18 }
 0x6db   :  { %6818 = vmatprep.subr.bf16.mxu0 %v6948_v45  ;;  %6599 = vmatprep.mubr.msk.f32.mxu1 %vm6949_vm3, %v6950_v7 }
 0x6dc   :  { %6610 = vmatprep.mubr.msk.f32.mxu0 %vm6949_vm3, %v6950_v7 }
 0x6dd   :  { %6814 = vmatpush3.bf16.msra.mxu1 %v6813_v22 }
 0x6de   :  { %6820 = vmatpush3.bf16.msra.mxu0 %v6819_v23  ;;  %6821 = vmatprep.subr.bf16.mxu1 %v6948_v45 }
 0x6df   :  { %6827 = vmatprep.subr.bf16.mxu0 %v6948_v45 }
 0x6e0   :  { %6600 = vmatmul.mubr.msk.f32.vlgmr.msra.gmra.mrb[114].mxu1 %vm2477_vm2, %v7836_v31  ;;  %v5678_v31 = vld [vmem:[%s8066_s12 + $0x1e8] sm:$0xff] }
 0x6e1   :  { %6823 = vmatpush3.bf16.msra.mxu1 %v6822_v26  ;;  %6611 = vmatmul.mubr.msk.f32.vlgmr.msra.gmra.mrb[24].mxu0 %vm2477_vm2, %v7832_v29  ;;  %v5677_v29 = vld [vmem:[%s8066_s12 + $0x1e0] sm:$0xff] }
 0x6e2   :  { %6829 = vmatpush3.bf16.msra.mxu0 %v6828_v27  ;;  %6824 = vmatprep.subr.bf16.mxu1 %v6948_v45  ;;  %v6840_v40 = vpack.c.bf16 %v5678_v31, %v5677_v29 }
 0x6e3   :  { %6830 = vmatprep.subr.bf16.mxu0 %v6948_v45  ;;  %6621 = vmatprep.mubr.msk.f32.mxu1 %vm6949_vm3, %v6950_v7 }
 0x6e4   :  { %6632 = vmatprep.mubr.msk.f32.mxu0 %vm6949_vm3, %v6950_v7 }
 0x6e5   :  { %6826 = vmatpush3.bf16.msra.mxu1 %v6825_v34 }
 0x6e6   :  { %6832 = vmatpush3.bf16.msra.mxu0 %v6831_v35  ;;  %6833 = vmatprep.subr.bf16.mxu1 %v6948_v45 }
 0x6e7   :  { %6839 = vmatprep.subr.bf16.mxu0 %v6948_v45 }
 0x6e8   :  { %6622 = vmatmul.mubr.msk.f32.vlgmr.msra.gmra.mrb[116].mxu1 %vm2477_vm2, %v7855_v41 }
 0x6e9   :  { %6835 = vmatpush3.bf16.msra.mxu1 %v6834_v38  ;;  %6633 = vmatmul.mubr.msk.f32.vlgmr.msra.gmra.mrb[26].mxu0 %vm2477_vm2, %v7852_v39  ;;  %v19_v39 = vstv %s8067_s13 }
 0x6ea   :  { %6841 = vmatpush3.bf16.msra.mxu0 %v6840_v40  ;;  %6836 = vmatprep.subr.bf16.mxu1 %v6948_v45  ;;  %20 = vst [vmem:[#allocation2] sm:$0x1] %v19_v39 }
 0x6eb   :  { %6842 = vmatprep.subr.bf16.mxu0 %v6948_v45  ;;  %6643 = vmatprep.mubr.msk.f32.mxu1 %vm6949_vm3, %v6950_v7 }
 0x6ec   :  { %6654 = vmatprep.mubr.msk.f32.mxu0 %vm6949_vm3, %v6950_v7 }
 0x6ed   :  { %6838 = vmatpush3.bf16.msra.mxu1 %v6837_v47 }
 0x6ee   :  { %6844 = vmatpush3.bf16.msra.mxu0 %v6843_v48 }
 0x6f0   :  { %6644 = vmatmul.mubr.msk.f32.vlgmr.msra.gmra.mrb[118].mxu1 %vm2477_vm2, %v7878_v53 }
 0x6f1   :  { %6655 = vmatmul.mubr.msk.f32.vlgmr.msra.gmra.mrb[28].mxu0 %vm2477_vm2, %v7874_v50  ;;  %v5682_v28 = vld [vmem:[#allocation2] ss:$0 sm:$0xff] }
 0x78b   :  { %v4229_v45 = vpop.f32.mrb[104].mxu1 }
 0x78c   :  { %v4302_v41 = vpop.f32.mrb[14].mxu0  ;;  %v6491_v30 = vpop.f32.mrb[105].mxu1 }
 0x78d   :  { %v4303_v52 = vadd.f32 %v4302_v41, %v4229_v45  ;;  %v6502_v56 = vpop.f32.mrb[15].mxu0 }
 0x793   :  { %v4380_v57 = vpop.f32.mrb[106].mxu1 }
 0x794   :  { %v4384_v7 = vadd.f32 %v4380_v57, %v4303_v52  ;;  %v4459_v58 = vpop.f32.mrb[16].mxu0  ;;  %v6513_v59 = vpop.f32.mrb[107].mxu1 }
 0x795   :  { %v6524_v49 = vpop.f32.mrb[17].mxu0 }
 0x796   :  { %v4463_v51 = vadd.f32 %v4459_v58, %v4384_v7 }
 0x79b   :  { %v4538_v53 = vpop.f32.mrb[108].mxu1 }
 0x79c   :  { %v4542_v54 = vadd.f32 %v4538_v53, %v4463_v51  ;;  %v4617_v55 = vpop.f32.mrb[18].mxu0  ;;  %v6535_v50 = vpop.f32.mrb[109].mxu1 }
 0x79d   :  { %v6546_v60 = vpop.f32.mrb[19].mxu0 }
 0x79e   :  { %v4621_v61 = vadd.f32 %v4617_v55, %v4542_v54 }
 0x7a3   :  { %v4696_v62 = vpop.f32.mrb[110].mxu1 }
 0x7a4   :  { %v4700_v63 = vadd.f32 %v4696_v62, %v4621_v61  ;;  %v4775_v0 = vpop.f32.mrb[20].mxu0  ;;  %v6557_v1 = vpop.f32.mrb[111].mxu1 }
 0x7a5   :  { %v6568_v2 = vpop.f32.mrb[21].mxu0 }
 0x7a6   :  { %v4779_v3 = vadd.f32 %v4775_v0, %v4700_v63 }
 0x7ab   :  { %v4854_v4 = vpop.f32.mrb[112].mxu1 }
 0x7ac   :  { %v4858_v5 = vadd.f32 %v4854_v4, %v4779_v3  ;;  %v4933_v6 = vpop.f32.mrb[22].mxu0  ;;  %v6579_v8 = vpop.f32.mrb[113].mxu1 }
 0x7ad   :  { %v6590_v9 = vpop.f32.mrb[23].mxu0 }
 0x7ae   :  { %v4937_v10 = vadd.f32 %v4933_v6, %v4858_v5 }
 0x7b3   :  { %v5012_v11 = vpop.f32.mrb[114].mxu1 }
 0x7b4   :  { %v5016_v12 = vadd.f32 %v5012_v11, %v4937_v10  ;;  %v5091_v13 = vpop.f32.mrb[24].mxu0  ;;  %v6601_v14 = vpop.f32.mrb[115].mxu1 }
 0x7b5   :  { %v6612_v15 = vpop.f32.mrb[25].mxu0 }
 0x7b6   :  { %v5095_v16 = vadd.f32 %v5091_v13, %v5016_v12 }
 0x7bb   :  { %v5170_v17 = vpop.f32.mrb[116].mxu1 }
 0x7bc   :  { %v5174_v19 = vadd.f32 %v5170_v17, %v5095_v16  ;;  %v5249_v22 = vpop.f32.mrb[26].mxu0  ;;  %v6623_v23 = vpop.f32.mrb[117].mxu1 }
 0x7bd   :  { %v6634_v24 = vpop.f32.mrb[27].mxu0 }
 0x7be   :  { %v5253_v25 = vadd.f32 %v5249_v22, %v5174_v19 }
 0x7c3   :  { %v5328_v18 = vpop.f32.mrb[118].mxu1 }
 0x7c4   :  { %v5332_v21 = vadd.f32 %v5328_v18, %v5253_v25  ;;  %v5407_v26 = vpop.f32.mrb[28].mxu0  ;;  %v6645_v27 = vpop.f32.mrb[119].mxu1 }
 0x7c5   :  { %v6656_v20 = vpop.f32.mrb[29].mxu0 }
 0x7c6   :  { %v5411_v32 = vadd.f32 %v5407_v26, %v5332_v21 }
 0x7c8   :  { %v5419_v33 = vadd.f32 %v5682_v28, %v5411_v32 }
 0x7ca   :  { %v5683_v34 = vmul.f32 -1.442695, %v5419_v33 }
 0x7cc   :  { %6944 = vpow2.f32 %v5683_v34 }
 0x7d6   :  { %v6945_v35 = vpop.eup %6944 }
 0x7d7   :  { %v5423_v36 = vadd.f32 1.0, %v6945_v35 }
 0x7d9   :  { %6946 = vrcp.f32 %v5423_v36 }
 0x7e3   :  { %v6947_v37 = vpop.eup %6946 }
 0x7e4   :  { %5427 = vst.msk [vmem:[%s8068_s14] sm:$0x3] %vm5426_vm4, %v6947_v37 }

</bundles_post_ra>
